<compile_context>
chip_gen: v5e
topology: v5e:2x2
jax: 0.10.0
libtpu: 0.0.40
codegen_flags: <defaults>
</compile_context>

<pallas_src>
import jax
import jax.numpy as jnp
import numpy as np
from jax.experimental import pallas as pl
from jax.experimental.pallas import tpu as pltpu

_EPS = 1e-5


def _branch6_kernel(w_ref, gamma_ref, beta_ref, xe_ref, xo_ref, o_ref):
    # w_ref:     SMEM (C_out*C_in,)  f32   flattened 1x1 conv weight
    # gamma_ref: SMEM (C_out,)       f32
    # beta_ref:  SMEM (C_out,)       f32
    # xe_ref:    VMEM (N, C_in, Lh)  f32   x[:, :, 0::2]  (even positions)
    # xo_ref:    VMEM (N, C_in, Lh)  f32   x[:, :, 1::2]  (odd positions)
    # o_ref:     VMEM (N, C_out, Lh) f32
    N, C_in, Lh = xe_ref.shape
    C_out = o_ref.shape[1]
    inv_cnt = 1.0 / float(N * 2 * Lh)

    # Load each input-channel slab once; reused for every output channel.
    xe = [xe_ref[:, ci, :] for ci in range(C_in)]   # each (N, Lh), L on lanes
    xo = [xo_ref[:, ci, :] for ci in range(C_in)]

    for co in range(C_out):
        # ---- 1x1 Conv1d (no bias): scalar-broadcast FMAs on the VPU ----
        w0 = w_ref[co * C_in]
        ye = w0 * xe[0]
        yo = w0 * xo[0]
        for ci in range(1, C_in):
            wv = w_ref[co * C_in + ci]
            ye = ye + wv * xe[ci]
            yo = yo + wv * xo[ci]

        # ---- BatchNorm1d (training mode): one-pass sum / sum-of-squares ----
        s = jnp.sum(ye, keepdims=True) + jnp.sum(yo, keepdims=True)        # (1,1)
        sq = jnp.sum(ye * ye, keepdims=True) + jnp.sum(yo * yo, keepdims=True)
        mean = s * inv_cnt
        var = jnp.maximum(sq * inv_cnt - mean * mean, 0.0)                 # biased
        scale = gamma_ref[co] * jax.lax.rsqrt(var + _EPS)                  # (1,1)
        shift = beta_ref[co] - mean * scale                                # (1,1)

        # ---- fused scale/shift + ReLU ----
        ze = jnp.maximum(ye * scale + shift, 0.0)   # z at even positions 2j
        zo = jnp.maximum(yo * scale + shift, 0.0)   # z at odd positions 2j+1

        # ---- MaxPool1d(kernel=3, stride=2, padding=1) ----
        # out[j] = max(z[2j-1], z[2j], z[2j+1]); z >= 0 after ReLU and every
        # window has a real element, so the left pad can be 0 instead of -inf.
        zo_prev = jnp.concatenate(
            [jnp.zeros((N, 1), jnp.float32), zo[:, : Lh - 1]], axis=1)
        o_ref[:, co, :] = jnp.maximum(jnp.maximum(ze, zo), zo_prev)


@jax.jit
def branch6_forward(x_ncl, conv_w, gamma, beta):
    """x_ncl: (N, C_in, L) f32; conv_w: (C_out, C_in); gamma/beta: (C_out,)."""
    N, C_in, L = x_ncl.shape
    C_out = conv_w.shape[0]
    assert L % 2 == 0, "kernel assumes even length L"
    Lh = L // 2                      # MaxPool1d(3, 2, padding=1) output length

    x = x_ncl.astype(jnp.float32)
    # Free reshape + cheap slices (single XLA fusion): hands the kernel dense,
    # already-deinterleaved even/odd length slabs (no transposes anywhere).
    x_pairs = x.reshape(N, C_in, Lh, 2)
    x_even = x_pairs[..., 0]                       # (N, C_in, Lh)
    x_odd = x_pairs[..., 1]                        # (N, C_in, Lh)

    w_flat = conv_w.astype(jnp.float32).reshape(C_out * C_in)
    gamma_f = gamma.astype(jnp.float32).reshape(C_out)
    beta_f = beta.astype(jnp.float32).reshape(C_out)

    return pl.pallas_call(
        _branch6_kernel,
        out_shape=jax.ShapeDtypeStruct((N, C_out, Lh), jnp.float32),
        in_specs=[
            pl.BlockSpec(memory_space=pltpu.MemorySpace.SMEM),   # conv weight
            pl.BlockSpec(memory_space=pltpu.MemorySpace.SMEM),   # gamma
            pl.BlockSpec(memory_space=pltpu.MemorySpace.SMEM),   # beta
            pl.BlockSpec(memory_space=pltpu.MemorySpace.VMEM),   # x even
            pl.BlockSpec(memory_space=pltpu.MemorySpace.VMEM),   # x odd
        ],
        out_specs=pl.BlockSpec(memory_space=pltpu.MemorySpace.VMEM),
        compiler_params=pltpu.CompilerParams(vmem_limit_bytes=32 * 1024 * 1024),
    )(w_flat, gamma_f, beta_f, x_even, x_odd)


def _reference(x_ncl, conv_w, gamma, beta):
    """Pure-JAX reference mirroring the PyTorch forward (training-mode BN)."""
    y = jnp.einsum("oc,ncl->nol", conv_w, x_ncl)                    # 1x1 conv, no bias
    mean = jnp.mean(y, axis=(0, 2), keepdims=True)
    var = jnp.mean((y - mean) ** 2, axis=(0, 2), keepdims=True)
    y = (y - mean) / jnp.sqrt(var + _EPS)
    y = y * gamma[None, :, None] + beta[None, :, None]
    y = jnp.maximum(y, 0.0)
    N, C, L = y.shape
    yp = jnp.concatenate(
        [jnp.full((N, C, 1), -jnp.inf), y, jnp.full((N, C, 1), -jnp.inf)], axis=-1
    )
    L_out = (L + 2 - 3) // 2 + 1
    wins = jnp.stack([yp[:, :, 2 * l: 2 * l + 3] for l in range(L_out)], axis=2)
    return jnp.max(wins, axis=-1)


if __name__ == "__main__":
    key = jax.random.PRNGKey(0)
    k1, k2, k3, k4 = jax.random.split(key, 4)

    N, C_in, C_out, L = 2, 4, 8, 16                 # stride arg unused in forward
    x = jax.random.normal(k1, (N, C_in, L), dtype=jnp.float32)
    conv_w = jax.random.normal(k2, (C_out, C_in), dtype=jnp.float32) * 0.1
    gamma = 1.0 + 0.1 * jax.random.normal(k3, (C_out,), dtype=jnp.float32)
    beta = 0.1 * jax.random.normal(k4, (C_out,), dtype=jnp.float32)

    out = jax.block_until_ready(branch6_forward(x, conv_w, gamma, beta))
    ref = jax.block_until_ready(_reference(x, conv_w, gamma, beta))
    assert out.shape == (N, C_out, L // 2)
    np.testing.assert_allclose(np.asarray(out), np.asarray(ref), rtol=1e-4, atol=1e-5)

    print("KERNEL_OK")
</pallas_src>

<mosaic_0001>
module attributes {stable_mosaic.version = 11 : i64} {
  func.func @_branch6_kernel(%arg0: memref<32xf32, #tpu.memory_space<smem>>, %arg1: memref<8xf32, #tpu.memory_space<smem>>, %arg2: memref<8xf32, #tpu.memory_space<smem>>, %arg3: memref<2x4x8xf32, #tpu.memory_space<vmem>>, %arg4: memref<2x4x8xf32, #tpu.memory_space<vmem>>, %arg5: memref<2x8x8xf32, #tpu.memory_space<vmem>>) attributes {dimension_semantics = [], scalar_prefetch = 0 : i64, scratch_operands = 0 : i64, tpu.core_type = #tpu.core_type<tc>} {
    %c0 = arith.constant 0 : index
    %c0_0 = arith.constant 0 : index
    %c0_1 = arith.constant 0 : index
    %0 = vector.load %arg3[%c0, %c0_0, %c0_1] : memref<2x4x8xf32, #tpu.memory_space<vmem>>, vector<2x1x8xf32>
    %1 = vector.shape_cast %0 : vector<2x1x8xf32> to vector<2x8xf32>
    %c0_2 = arith.constant 0 : index
    %c1 = arith.constant 1 : index
    %c0_3 = arith.constant 0 : index
    %2 = vector.load %arg3[%c0_2, %c1, %c0_3] : memref<2x4x8xf32, #tpu.memory_space<vmem>>, vector<2x1x8xf32>
    %3 = vector.shape_cast %2 : vector<2x1x8xf32> to vector<2x8xf32>
    %c0_4 = arith.constant 0 : index
    %c2 = arith.constant 2 : index
    %c0_5 = arith.constant 0 : index
    %4 = vector.load %arg3[%c0_4, %c2, %c0_5] : memref<2x4x8xf32, #tpu.memory_space<vmem>>, vector<2x1x8xf32>
    %5 = vector.shape_cast %4 : vector<2x1x8xf32> to vector<2x8xf32>
    %c0_6 = arith.constant 0 : index
    %c3 = arith.constant 3 : index
    %c0_7 = arith.constant 0 : index
    %6 = vector.load %arg3[%c0_6, %c3, %c0_7] : memref<2x4x8xf32, #tpu.memory_space<vmem>>, vector<2x1x8xf32>
    %7 = vector.shape_cast %6 : vector<2x1x8xf32> to vector<2x8xf32>
    %c0_8 = arith.constant 0 : index
    %c0_9 = arith.constant 0 : index
    %c0_10 = arith.constant 0 : index
    %8 = vector.load %arg4[%c0_8, %c0_9, %c0_10] : memref<2x4x8xf32, #tpu.memory_space<vmem>>, vector<2x1x8xf32>
    %9 = vector.shape_cast %8 : vector<2x1x8xf32> to vector<2x8xf32>
    %c0_11 = arith.constant 0 : index
    %c1_12 = arith.constant 1 : index
    %c0_13 = arith.constant 0 : index
    %10 = vector.load %arg4[%c0_11, %c1_12, %c0_13] : memref<2x4x8xf32, #tpu.memory_space<vmem>>, vector<2x1x8xf32>
    %11 = vector.shape_cast %10 : vector<2x1x8xf32> to vector<2x8xf32>
    %c0_14 = arith.constant 0 : index
    %c2_15 = arith.constant 2 : index
    %c0_16 = arith.constant 0 : index
    %12 = vector.load %arg4[%c0_14, %c2_15, %c0_16] : memref<2x4x8xf32, #tpu.memory_space<vmem>>, vector<2x1x8xf32>
    %13 = vector.shape_cast %12 : vector<2x1x8xf32> to vector<2x8xf32>
    %c0_17 = arith.constant 0 : index
    %c3_18 = arith.constant 3 : index
    %c0_19 = arith.constant 0 : index
    %14 = vector.load %arg4[%c0_17, %c3_18, %c0_19] : memref<2x4x8xf32, #tpu.memory_space<vmem>>, vector<2x1x8xf32>
    %15 = vector.shape_cast %14 : vector<2x1x8xf32> to vector<2x8xf32>
    %c0_20 = arith.constant 0 : index
    %16 = memref.load %arg0[%c0_20] : memref<32xf32, #tpu.memory_space<smem>>
    %17 = vector.broadcast %16 : f32 to vector<2x8xf32>
    %18 = arith.mulf %17, %1 : vector<2x8xf32>
    %19 = vector.broadcast %16 : f32 to vector<2x8xf32>
    %20 = arith.mulf %19, %9 : vector<2x8xf32>
    %c1_21 = arith.constant 1 : index
    %21 = memref.load %arg0[%c1_21] : memref<32xf32, #tpu.memory_space<smem>>
    %22 = vector.broadcast %21 : f32 to vector<2x8xf32>
    %23 = arith.mulf %22, %3 : vector<2x8xf32>
    %24 = arith.addf %18, %23 : vector<2x8xf32>
    %25 = vector.broadcast %21 : f32 to vector<2x8xf32>
    %26 = arith.mulf %25, %11 : vector<2x8xf32>
    %27 = arith.addf %20, %26 : vector<2x8xf32>
    %c2_22 = arith.constant 2 : index
    %28 = memref.load %arg0[%c2_22] : memref<32xf32, #tpu.memory_space<smem>>
    %29 = vector.broadcast %28 : f32 to vector<2x8xf32>
    %30 = arith.mulf %29, %5 : vector<2x8xf32>
    %31 = arith.addf %24, %30 : vector<2x8xf32>
    %32 = vector.broadcast %28 : f32 to vector<2x8xf32>
    %33 = arith.mulf %32, %13 : vector<2x8xf32>
    %34 = arith.addf %27, %33 : vector<2x8xf32>
    %c3_23 = arith.constant 3 : index
    %35 = memref.load %arg0[%c3_23] : memref<32xf32, #tpu.memory_space<smem>>
    %36 = vector.broadcast %35 : f32 to vector<2x8xf32>
    %37 = arith.mulf %36, %7 : vector<2x8xf32>
    %38 = arith.addf %31, %37 : vector<2x8xf32>
    %39 = vector.broadcast %35 : f32 to vector<2x8xf32>
    %40 = arith.mulf %39, %15 : vector<2x8xf32>
    %41 = arith.addf %34, %40 : vector<2x8xf32>
    %42 = vector.shape_cast %38 : vector<2x8xf32> to vector<1x2x8xf32>
    %cst = arith.constant dense<0.000000e+00> : vector<1xf32>
    %43 = vector.multi_reduction <add>, %42, %cst [1, 2] : vector<1x2x8xf32> to vector<1xf32>
    %44 = vector.shape_cast %43 : vector<1xf32> to vector<1x1x1xf32>
    %45 = vector.extract %44[0, 0, 0] : f32 from vector<1x1x1xf32>
    %46 = vector.broadcast %45 : f32 to vector<1x1xf32>
    %47 = vector.shape_cast %41 : vector<2x8xf32> to vector<1x2x8xf32>
    %cst_24 = arith.constant dense<0.000000e+00> : vector<1xf32>
    %48 = vector.multi_reduction <add>, %47, %cst_24 [1, 2] : vector<1x2x8xf32> to vector<1xf32>
    %49 = vector.shape_cast %48 : vector<1xf32> to vector<1x1x1xf32>
    %50 = vector.extract %49[0, 0, 0] : f32 from vector<1x1x1xf32>
    %51 = vector.broadcast %50 : f32 to vector<1x1xf32>
    %52 = arith.addf %46, %51 : vector<1x1xf32>
    %53 = arith.mulf %38, %38 : vector<2x8xf32>
    %54 = vector.shape_cast %53 : vector<2x8xf32> to vector<1x2x8xf32>
    %cst_25 = arith.constant dense<0.000000e+00> : vector<1xf32>
    %55 = vector.multi_reduction <add>, %54, %cst_25 [1, 2] : vector<1x2x8xf32> to vector<1xf32>
    %56 = vector.shape_cast %55 : vector<1xf32> to vector<1x1x1xf32>
    %57 = vector.extract %56[0, 0, 0] : f32 from vector<1x1x1xf32>
    %58 = vector.broadcast %57 : f32 to vector<1x1xf32>
    %59 = arith.mulf %41, %41 : vector<2x8xf32>
    %60 = vector.shape_cast %59 : vector<2x8xf32> to vector<1x2x8xf32>
    %cst_26 = arith.constant dense<0.000000e+00> : vector<1xf32>
    %61 = vector.multi_reduction <add>, %60, %cst_26 [1, 2] : vector<1x2x8xf32> to vector<1xf32>
    %62 = vector.shape_cast %61 : vector<1xf32> to vector<1x1x1xf32>
    %63 = vector.extract %62[0, 0, 0] : f32 from vector<1x1x1xf32>
    %64 = vector.broadcast %63 : f32 to vector<1x1xf32>
    %65 = arith.addf %58, %64 : vector<1x1xf32>
    %cst_27 = arith.constant 3.125000e-02 : f32
    %66 = vector.broadcast %cst_27 : f32 to vector<1x1xf32>
    %67 = arith.mulf %52, %66 : vector<1x1xf32>
    %cst_28 = arith.constant 3.125000e-02 : f32
    %68 = vector.broadcast %cst_28 : f32 to vector<1x1xf32>
    %69 = arith.mulf %65, %68 : vector<1x1xf32>
    %70 = arith.mulf %67, %67 : vector<1x1xf32>
    %71 = arith.subf %69, %70 : vector<1x1xf32>
    %cst_29 = arith.constant 0.000000e+00 : f32
    %72 = vector.broadcast %cst_29 : f32 to vector<1x1xf32>
    %73 = arith.maximumf %71, %72 : vector<1x1xf32>
    %c0_30 = arith.constant 0 : index
    %74 = memref.load %arg1[%c0_30] : memref<8xf32, #tpu.memory_space<smem>>
    %cst_31 = arith.constant 9.99999974E-6 : f32
    %75 = vector.broadcast %cst_31 : f32 to vector<1x1xf32>
    %76 = arith.addf %73, %75 : vector<1x1xf32>
    %77 = math.rsqrt %76 : vector<1x1xf32>
    %78 = vector.broadcast %74 : f32 to vector<1x1xf32>
    %79 = arith.mulf %78, %77 : vector<1x1xf32>
    %c0_32 = arith.constant 0 : index
    %80 = memref.load %arg2[%c0_32] : memref<8xf32, #tpu.memory_space<smem>>
    %81 = arith.mulf %67, %79 : vector<1x1xf32>
    %82 = vector.broadcast %80 : f32 to vector<1x1xf32>
    %83 = arith.subf %82, %81 : vector<1x1xf32>
    %84 = vector.broadcast %79 : vector<1x1xf32> to vector<2x8xf32>
    %85 = arith.mulf %38, %84 : vector<2x8xf32>
    %86 = vector.broadcast %83 : vector<1x1xf32> to vector<2x8xf32>
    %87 = arith.addf %85, %86 : vector<2x8xf32>
    %cst_33 = arith.constant 0.000000e+00 : f32
    %88 = vector.broadcast %cst_33 : f32 to vector<2x8xf32>
    %89 = arith.maximumf %87, %88 : vector<2x8xf32>
    %90 = vector.broadcast %79 : vector<1x1xf32> to vector<2x8xf32>
    %91 = arith.mulf %41, %90 : vector<2x8xf32>
    %92 = vector.broadcast %83 : vector<1x1xf32> to vector<2x8xf32>
    %93 = arith.addf %91, %92 : vector<2x8xf32>
    %cst_34 = arith.constant 0.000000e+00 : f32
    %94 = vector.broadcast %cst_34 : f32 to vector<2x8xf32>
    %95 = arith.maximumf %93, %94 : vector<2x8xf32>
    %cst_35 = arith.constant 0.000000e+00 : f32
    %96 = vector.broadcast %cst_35 : f32 to vector<2x1xf32>
    %97 = vector.extract_strided_slice %95 {offsets = [0, 0], sizes = [2, 7], strides = [1, 1]} : vector<2x8xf32> to vector<2x7xf32>
    %98 = tpu.concatenate %96, %97 in 1 : vector<2x1xf32>, vector<2x7xf32> -> vector<2x8xf32>
    %99 = arith.maximumf %89, %95 : vector<2x8xf32>
    %100 = arith.maximumf %99, %98 : vector<2x8xf32>
    %c0_36 = arith.constant 0 : index
    %c0_37 = arith.constant 0 : index
    %c0_38 = arith.constant 0 : index
    %101 = vector.load %arg5[%c0_36, %c0_37, %c0_38] : memref<2x8x8xf32, #tpu.memory_space<vmem>>, vector<2x1x8xf32>
    %102 = vector.shape_cast %101 : vector<2x1x8xf32> to vector<2x8xf32>
    %103 = vector.shape_cast %100 : vector<2x8xf32> to vector<2x1x8xf32>
    tpu.vector_store %arg5[%c0_36, %c0_37, %c0_38], %103 {strides = array<i32>} : memref<2x8x8xf32, #tpu.memory_space<vmem>>, vector<2x1x8xf32>,
    %c4 = arith.constant 4 : index
    %104 = memref.load %arg0[%c4] : memref<32xf32, #tpu.memory_space<smem>>
    %105 = vector.broadcast %104 : f32 to vector<2x8xf32>
    %106 = arith.mulf %105, %1 : vector<2x8xf32>
    %107 = vector.broadcast %104 : f32 to vector<2x8xf32>
    %108 = arith.mulf %107, %9 : vector<2x8xf32>
    %c5 = arith.constant 5 : index
    %109 = memref.load %arg0[%c5] : memref<32xf32, #tpu.memory_space<smem>>
    %110 = vector.broadcast %109 : f32 to vector<2x8xf32>
    %111 = arith.mulf %110, %3 : vector<2x8xf32>
    %112 = arith.addf %106, %111 : vector<2x8xf32>
    %113 = vector.broadcast %109 : f32 to vector<2x8xf32>
    %114 = arith.mulf %113, %11 : vector<2x8xf32>
    %115 = arith.addf %108, %114 : vector<2x8xf32>
    %c6 = arith.constant 6 : index
    %116 = memref.load %arg0[%c6] : memref<32xf32, #tpu.memory_space<smem>>
    %117 = vector.broadcast %116 : f32 to vector<2x8xf32>
    %118 = arith.mulf %117, %5 : vector<2x8xf32>
    %119 = arith.addf %112, %118 : vector<2x8xf32>
    %120 = vector.broadcast %116 : f32 to vector<2x8xf32>
    %121 = arith.mulf %120, %13 : vector<2x8xf32>
    %122 = arith.addf %115, %121 : vector<2x8xf32>
    %c7 = arith.constant 7 : index
    %123 = memref.load %arg0[%c7] : memref<32xf32, #tpu.memory_space<smem>>
    %124 = vector.broadcast %123 : f32 to vector<2x8xf32>
    %125 = arith.mulf %124, %7 : vector<2x8xf32>
    %126 = arith.addf %119, %125 : vector<2x8xf32>
    %127 = vector.broadcast %123 : f32 to vector<2x8xf32>
    %128 = arith.mulf %127, %15 : vector<2x8xf32>
    %129 = arith.addf %122, %128 : vector<2x8xf32>
    %130 = vector.shape_cast %126 : vector<2x8xf32> to vector<1x2x8xf32>
    %cst_39 = arith.constant dense<0.000000e+00> : vector<1xf32>
    %131 = vector.multi_reduction <add>, %130, %cst_39 [1, 2] : vector<1x2x8xf32> to vector<1xf32>
    %132 = vector.shape_cast %131 : vector<1xf32> to vector<1x1x1xf32>
    %133 = vector.extract %132[0, 0, 0] : f32 from vector<1x1x1xf32>
    %134 = vector.broadcast %133 : f32 to vector<1x1xf32>
    %135 = vector.shape_cast %129 : vector<2x8xf32> to vector<1x2x8xf32>
    %cst_40 = arith.constant dense<0.000000e+00> : vector<1xf32>
    %136 = vector.multi_reduction <add>, %135, %cst_40 [1, 2] : vector<1x2x8xf32> to vector<1xf32>
    %137 = vector.shape_cast %136 : vector<1xf32> to vector<1x1x1xf32>
    %138 = vector.extract %137[0, 0, 0] : f32 from vector<1x1x1xf32>
    %139 = vector.broadcast %138 : f32 to vector<1x1xf32>
    %140 = arith.addf %134, %139 : vector<1x1xf32>
    %141 = arith.mulf %126, %126 : vector<2x8xf32>
    %142 = vector.shape_cast %141 : vector<2x8xf32> to vector<1x2x8xf32>
    %cst_41 = arith.constant dense<0.000000e+00> : vector<1xf32>
    %143 = vector.multi_reduction <add>, %142, %cst_41 [1, 2] : vector<1x2x8xf32> to vector<1xf32>
    %144 = vector.shape_cast %143 : vector<1xf32> to vector<1x1x1xf32>
    %145 = vector.extract %144[0, 0, 0] : f32 from vector<1x1x1xf32>
    %146 = vector.broadcast %145 : f32 to vector<1x1xf32>
    %147 = arith.mulf %129, %129 : vector<2x8xf32>
    %148 = vector.shape_cast %147 : vector<2x8xf32> to vector<1x2x8xf32>
    %cst_42 = arith.constant dense<0.000000e+00> : vector<1xf32>
    %149 = vector.multi_reduction <add>, %148, %cst_42 [1, 2] : vector<1x2x8xf32> to vector<1xf32>
    %150 = vector.shape_cast %149 : vector<1xf32> to vector<1x1x1xf32>
    %151 = vector.extract %150[0, 0, 0] : f32 from vector<1x1x1xf32>
    %152 = vector.broadcast %151 : f32 to vector<1x1xf32>
    %153 = arith.addf %146, %152 : vector<1x1xf32>
    %cst_43 = arith.constant 3.125000e-02 : f32
    %154 = vector.broadcast %cst_43 : f32 to vector<1x1xf32>
    %155 = arith.mulf %140, %154 : vector<1x1xf32>
    %cst_44 = arith.constant 3.125000e-02 : f32
    %156 = vector.broadcast %cst_44 : f32 to vector<1x1xf32>
    %157 = arith.mulf %153, %156 : vector<1x1xf32>
    %158 = arith.mulf %155, %155 : vector<1x1xf32>
    %159 = arith.subf %157, %158 : vector<1x1xf32>
    %cst_45 = arith.constant 0.000000e+00 : f32
    %160 = vector.broadcast %cst_45 : f32 to vector<1x1xf32>
    %161 = arith.maximumf %159, %160 : vector<1x1xf32>
    %c1_46 = arith.constant 1 : index
    %162 = memref.load %arg1[%c1_46] : memref<8xf32, #tpu.memory_space<smem>>
    %cst_47 = arith.constant 9.99999974E-6 : f32
    %163 = vector.broadcast %cst_47 : f32 to vector<1x1xf32>
    %164 = arith.addf %161, %163 : vector<1x1xf32>
    %165 = math.rsqrt %164 : vector<1x1xf32>
    %166 = vector.broadcast %162 : f32 to vector<1x1xf32>
    %167 = arith.mulf %166, %165 : vector<1x1xf32>
    %c1_48 = arith.constant 1 : index
    %168 = memref.load %arg2[%c1_48] : memref<8xf32, #tpu.memory_space<smem>>
    %169 = arith.mulf %155, %167 : vector<1x1xf32>
    %170 = vector.broadcast %168 : f32 to vector<1x1xf32>
    %171 = arith.subf %170, %169 : vector<1x1xf32>
    %172 = vector.broadcast %167 : vector<1x1xf32> to vector<2x8xf32>
    %173 = arith.mulf %126, %172 : vector<2x8xf32>
    %174 = vector.broadcast %171 : vector<1x1xf32> to vector<2x8xf32>
    %175 = arith.addf %173, %174 : vector<2x8xf32>
    %cst_49 = arith.constant 0.000000e+00 : f32
    %176 = vector.broadcast %cst_49 : f32 to vector<2x8xf32>
    %177 = arith.maximumf %175, %176 : vector<2x8xf32>
    %178 = vector.broadcast %167 : vector<1x1xf32> to vector<2x8xf32>
    %179 = arith.mulf %129, %178 : vector<2x8xf32>
    %180 = vector.broadcast %171 : vector<1x1xf32> to vector<2x8xf32>
    %181 = arith.addf %179, %180 : vector<2x8xf32>
    %cst_50 = arith.constant 0.000000e+00 : f32
    %182 = vector.broadcast %cst_50 : f32 to vector<2x8xf32>
    %183 = arith.maximumf %181, %182 : vector<2x8xf32>
    %cst_51 = arith.constant 0.000000e+00 : f32
    %184 = vector.broadcast %cst_51 : f32 to vector<2x1xf32>
    %185 = vector.extract_strided_slice %183 {offsets = [0, 0], sizes = [2, 7], strides = [1, 1]} : vector<2x8xf32> to vector<2x7xf32>
    %186 = tpu.concatenate %184, %185 in 1 : vector<2x1xf32>, vector<2x7xf32> -> vector<2x8xf32>
    %187 = arith.maximumf %177, %183 : vector<2x8xf32>
    %188 = arith.maximumf %187, %186 : vector<2x8xf32>
    %c0_52 = arith.constant 0 : index
    %c1_53 = arith.constant 1 : index
    %c0_54 = arith.constant 0 : index
    %189 = vector.load %arg5[%c0_52, %c1_53, %c0_54] : memref<2x8x8xf32, #tpu.memory_space<vmem>>, vector<2x1x8xf32>
    %190 = vector.shape_cast %189 : vector<2x1x8xf32> to vector<2x8xf32>
    %191 = vector.shape_cast %188 : vector<2x8xf32> to vector<2x1x8xf32>
    tpu.vector_store %arg5[%c0_52, %c1_53, %c0_54], %191 {strides = array<i32>} : memref<2x8x8xf32, #tpu.memory_space<vmem>>, vector<2x1x8xf32>,
    %c8 = arith.constant 8 : index
    %192 = memref.load %arg0[%c8] : memref<32xf32, #tpu.memory_space<smem>>
    %193 = vector.broadcast %192 : f32 to vector<2x8xf32>
    %194 = arith.mulf %193, %1 : vector<2x8xf32>
    %195 = vector.broadcast %192 : f32 to vector<2x8xf32>
    %196 = arith.mulf %195, %9 : vector<2x8xf32>
    %c9 = arith.constant 9 : index
    %197 = memref.load %arg0[%c9] : memref<32xf32, #tpu.memory_space<smem>>
    %198 = vector.broadcast %197 : f32 to vector<2x8xf32>
    %199 = arith.mulf %198, %3 : vector<2x8xf32>
    %200 = arith.addf %194, %199 : vector<2x8xf32>
    %201 = vector.broadcast %197 : f32 to vector<2x8xf32>
    %202 = arith.mulf %201, %11 : vector<2x8xf32>
    %203 = arith.addf %196, %202 : vector<2x8xf32>
    %c10 = arith.constant 10 : index
    %204 = memref.load %arg0[%c10] : memref<32xf32, #tpu.memory_space<smem>>
    %205 = vector.broadcast %204 : f32 to vector<2x8xf32>
    %206 = arith.mulf %205, %5 : vector<2x8xf32>
    %207 = arith.addf %200, %206 : vector<2x8xf32>
    %208 = vector.broadcast %204 : f32 to vector<2x8xf32>
    %209 = arith.mulf %208, %13 : vector<2x8xf32>
    %210 = arith.addf %203, %209 : vector<2x8xf32>
    %c11 = arith.constant 11 : index
    %211 = memref.load %arg0[%c11] : memref<32xf32, #tpu.memory_space<smem>>
    %212 = vector.broadcast %211 : f32 to vector<2x8xf32>
    %213 = arith.mulf %212, %7 : vector<2x8xf32>
    %214 = arith.addf %207, %213 : vector<2x8xf32>
    %215 = vector.broadcast %211 : f32 to vector<2x8xf32>
    %216 = arith.mulf %215, %15 : vector<2x8xf32>
    %217 = arith.addf %210, %216 : vector<2x8xf32>
    %218 = vector.shape_cast %214 : vector<2x8xf32> to vector<1x2x8xf32>
    %cst_55 = arith.constant dense<0.000000e+00> : vector<1xf32>
    %219 = vector.multi_reduction <add>, %218, %cst_55 [1, 2] : vector<1x2x8xf32> to vector<1xf32>
    %220 = vector.shape_cast %219 : vector<1xf32> to vector<1x1x1xf32>
    %221 = vector.extract %220[0, 0, 0] : f32 from vector<1x1x1xf32>
    %222 = vector.broadcast %221 : f32 to vector<1x1xf32>
    %223 = vector.shape_cast %217 : vector<2x8xf32> to vector<1x2x8xf32>
    %cst_56 = arith.constant dense<0.000000e+00> : vector<1xf32>
    %224 = vector.multi_reduction <add>, %223, %cst_56 [1, 2] : vector<1x2x8xf32> to vector<1xf32>
    %225 = vector.shape_cast %224 : vector<1xf32> to vector<1x1x1xf32>
    %226 = vector.extract %225[0, 0, 0] : f32 from vector<1x1x1xf32>
    %227 = vector.broadcast %226 : f32 to vector<1x1xf32>
    %228 = arith.addf %222, %227 : vector<1x1xf32>
    %229 = arith.mulf %214, %214 : vector<2x8xf32>
    %230 = vector.shape_cast %229 : vector<2x8xf32> to vector<1x2x8xf32>
    %cst_57 = arith.constant dense<0.000000e+00> : vector<1xf32>
    %231 = vector.multi_reduction <add>, %230, %cst_57 [1, 2] : vector<1x2x8xf32> to vector<1xf32>
    %232 = vector.shape_cast %231 : vector<1xf32> to vector<1x1x1xf32>
    %233 = vector.extract %232[0, 0, 0] : f32 from vector<1x1x1xf32>
    %234 = vector.broadcast %233 : f32 to vector<1x1xf32>
    %235 = arith.mulf %217, %217 : vector<2x8xf32>
    %236 = vector.shape_cast %235 : vector<2x8xf32> to vector<1x2x8xf32>
    %cst_58 = arith.constant dense<0.000000e+00> : vector<1xf32>
    %237 = vector.multi_reduction <add>, %236, %cst_58 [1, 2] : vector<1x2x8xf32> to vector<1xf32>
    %238 = vector.shape_cast %237 : vector<1xf32> to vector<1x1x1xf32>
    %239 = vector.extract %238[0, 0, 0] : f32 from vector<1x1x1xf32>
    %240 = vector.broadcast %239 : f32 to vector<1x1xf32>
    %241 = arith.addf %234, %240 : vector<1x1xf32>
    %cst_59 = arith.constant 3.125000e-02 : f32
    %242 = vector.broadcast %cst_59 : f32 to vector<1x1xf32>
    %243 = arith.mulf %228, %242 : vector<1x1xf32>
    %cst_60 = arith.constant 3.125000e-02 : f32
    %244 = vector.broadcast %cst_60 : f32 to vector<1x1xf32>
    %245 = arith.mulf %241, %244 : vector<1x1xf32>
    %246 = arith.mulf %243, %243 : vector<1x1xf32>
    %247 = arith.subf %245, %246 : vector<1x1xf32>
    %cst_61 = arith.constant 0.000000e+00 : f32
    %248 = vector.broadcast %cst_61 : f32 to vector<1x1xf32>
    %249 = arith.maximumf %247, %248 : vector<1x1xf32>
    %c2_62 = arith.constant 2 : index
    %250 = memref.load %arg1[%c2_62] : memref<8xf32, #tpu.memory_space<smem>>
    %cst_63 = arith.constant 9.99999974E-6 : f32
    %251 = vector.broadcast %cst_63 : f32 to vector<1x1xf32>
    %252 = arith.addf %249, %251 : vector<1x1xf32>
    %253 = math.rsqrt %252 : vector<1x1xf32>
    %254 = vector.broadcast %250 : f32 to vector<1x1xf32>
    %255 = arith.mulf %254, %253 : vector<1x1xf32>
    %c2_64 = arith.constant 2 : index
    %256 = memref.load %arg2[%c2_64] : memref<8xf32, #tpu.memory_space<smem>>
    %257 = arith.mulf %243, %255 : vector<1x1xf32>
    %258 = vector.broadcast %256 : f32 to vector<1x1xf32>
    %259 = arith.subf %258, %257 : vector<1x1xf32>
    %260 = vector.broadcast %255 : vector<1x1xf32> to vector<2x8xf32>
    %261 = arith.mulf %214, %260 : vector<2x8xf32>
    %262 = vector.broadcast %259 : vector<1x1xf32> to vector<2x8xf32>
    %263 = arith.addf %261, %262 : vector<2x8xf32>
    %cst_65 = arith.constant 0.000000e+00 : f32
    %264 = vector.broadcast %cst_65 : f32 to vector<2x8xf32>
    %265 = arith.maximumf %263, %264 : vector<2x8xf32>
    %266 = vector.broadcast %255 : vector<1x1xf32> to vector<2x8xf32>
    %267 = arith.mulf %217, %266 : vector<2x8xf32>
    %268 = vector.broadcast %259 : vector<1x1xf32> to vector<2x8xf32>
    %269 = arith.addf %267, %268 : vector<2x8xf32>
    %cst_66 = arith.constant 0.000000e+00 : f32
    %270 = vector.broadcast %cst_66 : f32 to vector<2x8xf32>
    %271 = arith.maximumf %269, %270 : vector<2x8xf32>
    %cst_67 = arith.constant 0.000000e+00 : f32
    %272 = vector.broadcast %cst_67 : f32 to vector<2x1xf32>
    %273 = vector.extract_strided_slice %271 {offsets = [0, 0], sizes = [2, 7], strides = [1, 1]} : vector<2x8xf32> to vector<2x7xf32>
    %274 = tpu.concatenate %272, %273 in 1 : vector<2x1xf32>, vector<2x7xf32> -> vector<2x8xf32>
    %275 = arith.maximumf %265, %271 : vector<2x8xf32>
    %276 = arith.maximumf %275, %274 : vector<2x8xf32>
    %c0_68 = arith.constant 0 : index
    %c2_69 = arith.constant 2 : index
    %c0_70 = arith.constant 0 : index
    %277 = vector.load %arg5[%c0_68, %c2_69, %c0_70] : memref<2x8x8xf32, #tpu.memory_space<vmem>>, vector<2x1x8xf32>
    %278 = vector.shape_cast %277 : vector<2x1x8xf32> to vector<2x8xf32>
    %279 = vector.shape_cast %276 : vector<2x8xf32> to vector<2x1x8xf32>
    tpu.vector_store %arg5[%c0_68, %c2_69, %c0_70], %279 {strides = array<i32>} : memref<2x8x8xf32, #tpu.memory_space<vmem>>, vector<2x1x8xf32>,
    %c12 = arith.constant 12 : index
    %280 = memref.load %arg0[%c12] : memref<32xf32, #tpu.memory_space<smem>>
    %281 = vector.broadcast %280 : f32 to vector<2x8xf32>
    %282 = arith.mulf %281, %1 : vector<2x8xf32>
    %283 = vector.broadcast %280 : f32 to vector<2x8xf32>
    %284 = arith.mulf %283, %9 : vector<2x8xf32>
    %c13 = arith.constant 13 : index
    %285 = memref.load %arg0[%c13] : memref<32xf32, #tpu.memory_space<smem>>
    %286 = vector.broadcast %285 : f32 to vector<2x8xf32>
    %287 = arith.mulf %286, %3 : vector<2x8xf32>
    %288 = arith.addf %282, %287 : vector<2x8xf32>
    %289 = vector.broadcast %285 : f32 to vector<2x8xf32>
    %290 = arith.mulf %289, %11 : vector<2x8xf32>
    %291 = arith.addf %284, %290 : vector<2x8xf32>
    %c14 = arith.constant 14 : index
    %292 = memref.load %arg0[%c14] : memref<32xf32, #tpu.memory_space<smem>>
    %293 = vector.broadcast %292 : f32 to vector<2x8xf32>
    %294 = arith.mulf %293, %5 : vector<2x8xf32>
    %295 = arith.addf %288, %294 : vector<2x8xf32>
    %296 = vector.broadcast %292 : f32 to vector<2x8xf32>
    %297 = arith.mulf %296, %13 : vector<2x8xf32>
    %298 = arith.addf %291, %297 : vector<2x8xf32>
    %c15 = arith.constant 15 : index
    %299 = memref.load %arg0[%c15] : memref<32xf32, #tpu.memory_space<smem>>
    %300 = vector.broadcast %299 : f32 to vector<2x8xf32>
    %301 = arith.mulf %300, %7 : vector<2x8xf32>
    %302 = arith.addf %295, %301 : vector<2x8xf32>
    %303 = vector.broadcast %299 : f32 to vector<2x8xf32>
    %304 = arith.mulf %303, %15 : vector<2x8xf32>
    %305 = arith.addf %298, %304 : vector<2x8xf32>
    %306 = vector.shape_cast %302 : vector<2x8xf32> to vector<1x2x8xf32>
    %cst_71 = arith.constant dense<0.000000e+00> : vector<1xf32>
    %307 = vector.multi_reduction <add>, %306, %cst_71 [1, 2] : vector<1x2x8xf32> to vector<1xf32>
    %308 = vector.shape_cast %307 : vector<1xf32> to vector<1x1x1xf32>
    %309 = vector.extract %308[0, 0, 0] : f32 from vector<1x1x1xf32>
    %310 = vector.broadcast %309 : f32 to vector<1x1xf32>
    %311 = vector.shape_cast %305 : vector<2x8xf32> to vector<1x2x8xf32>
    %cst_72 = arith.constant dense<0.000000e+00> : vector<1xf32>
    %312 = vector.multi_reduction <add>, %311, %cst_72 [1, 2] : vector<1x2x8xf32> to vector<1xf32>
    %313 = vector.shape_cast %312 : vector<1xf32> to vector<1x1x1xf32>
    %314 = vector.extract %313[0, 0, 0] : f32 from vector<1x1x1xf32>
    %315 = vector.broadcast %314 : f32 to vector<1x1xf32>
    %316 = arith.addf %310, %315 : vector<1x1xf32>
    %317 = arith.mulf %302, %302 : vector<2x8xf32>
    %318 = vector.shape_cast %317 : vector<2x8xf32> to vector<1x2x8xf32>
    %cst_73 = arith.constant dense<0.000000e+00> : vector<1xf32>
    %319 = vector.multi_reduction <add>, %318, %cst_73 [1, 2] : vector<1x2x8xf32> to vector<1xf32>
    %320 = vector.shape_cast %319 : vector<1xf32> to vector<1x1x1xf32>
    %321 = vector.extract %320[0, 0, 0] : f32 from vector<1x1x1xf32>
    %322 = vector.broadcast %321 : f32 to vector<1x1xf32>
    %323 = arith.mulf %305, %305 : vector<2x8xf32>
    %324 = vector.shape_cast %323 : vector<2x8xf32> to vector<1x2x8xf32>
    %cst_74 = arith.constant dense<0.000000e+00> : vector<1xf32>
    %325 = vector.multi_reduction <add>, %324, %cst_74 [1, 2] : vector<1x2x8xf32> to vector<1xf32>
    %326 = vector.shape_cast %325 : vector<1xf32> to vector<1x1x1xf32>
    %327 = vector.extract %326[0, 0, 0] : f32 from vector<1x1x1xf32>
    %328 = vector.broadcast %327 : f32 to vector<1x1xf32>
    %329 = arith.addf %322, %328 : vector<1x1xf32>
    %cst_75 = arith.constant 3.125000e-02 : f32
    %330 = vector.broadcast %cst_75 : f32 to vector<1x1xf32>
    %331 = arith.mulf %316, %330 : vector<1x1xf32>
    %cst_76 = arith.constant 3.125000e-02 : f32
    %332 = vector.broadcast %cst_76 : f32 to vector<1x1xf32>
    %333 = arith.mulf %329, %332 : vector<1x1xf32>
    %334 = arith.mulf %331, %331 : vector<1x1xf32>
    %335 = arith.subf %333, %334 : vector<1x1xf32>
    %cst_77 = arith.constant 0.000000e+00 : f32
    %336 = vector.broadcast %cst_77 : f32 to vector<1x1xf32>
    %337 = arith.maximumf %335, %336 : vector<1x1xf32>
    %c3_78 = arith.constant 3 : index
    %338 = memref.load %arg1[%c3_78] : memref<8xf32, #tpu.memory_space<smem>>
    %cst_79 = arith.constant 9.99999974E-6 : f32
    %339 = vector.broadcast %cst_79 : f32 to vector<1x1xf32>
    %340 = arith.addf %337, %339 : vector<1x1xf32>
    %341 = math.rsqrt %340 : vector<1x1xf32>
    %342 = vector.broadcast %338 : f32 to vector<1x1xf32>
    %343 = arith.mulf %342, %341 : vector<1x1xf32>
    %c3_80 = arith.constant 3 : index
    %344 = memref.load %arg2[%c3_80] : memref<8xf32, #tpu.memory_space<smem>>
    %345 = arith.mulf %331, %343 : vector<1x1xf32>
    %346 = vector.broadcast %344 : f32 to vector<1x1xf32>
    %347 = arith.subf %346, %345 : vector<1x1xf32>
    %348 = vector.broadcast %343 : vector<1x1xf32> to vector<2x8xf32>
    %349 = arith.mulf %302, %348 : vector<2x8xf32>
    %350 = vector.broadcast %347 : vector<1x1xf32> to vector<2x8xf32>
    %351 = arith.addf %349, %350 : vector<2x8xf32>
    %cst_81 = arith.constant 0.000000e+00 : f32
    %352 = vector.broadcast %cst_81 : f32 to vector<2x8xf32>
    %353 = arith.maximumf %351, %352 : vector<2x8xf32>
    %354 = vector.broadcast %343 : vector<1x1xf32> to vector<2x8xf32>
    %355 = arith.mulf %305, %354 : vector<2x8xf32>
    %356 = vector.broadcast %347 : vector<1x1xf32> to vector<2x8xf32>
    %357 = arith.addf %355, %356 : vector<2x8xf32>
    %cst_82 = arith.constant 0.000000e+00 : f32
    %358 = vector.broadcast %cst_82 : f32 to vector<2x8xf32>
    %359 = arith.maximumf %357, %358 : vector<2x8xf32>
    %cst_83 = arith.constant 0.000000e+00 : f32
    %360 = vector.broadcast %cst_83 : f32 to vector<2x1xf32>
    %361 = vector.extract_strided_slice %359 {offsets = [0, 0], sizes = [2, 7], strides = [1, 1]} : vector<2x8xf32> to vector<2x7xf32>
    %362 = tpu.concatenate %360, %361 in 1 : vector<2x1xf32>, vector<2x7xf32> -> vector<2x8xf32>
    %363 = arith.maximumf %353, %359 : vector<2x8xf32>
    %364 = arith.maximumf %363, %362 : vector<2x8xf32>
    %c0_84 = arith.constant 0 : index
    %c3_85 = arith.constant 3 : index
    %c0_86 = arith.constant 0 : index
    %365 = vector.load %arg5[%c0_84, %c3_85, %c0_86] : memref<2x8x8xf32, #tpu.memory_space<vmem>>, vector<2x1x8xf32>
    %366 = vector.shape_cast %365 : vector<2x1x8xf32> to vector<2x8xf32>
    %367 = vector.shape_cast %364 : vector<2x8xf32> to vector<2x1x8xf32>
    tpu.vector_store %arg5[%c0_84, %c3_85, %c0_86], %367 {strides = array<i32>} : memref<2x8x8xf32, #tpu.memory_space<vmem>>, vector<2x1x8xf32>,
    %c16 = arith.constant 16 : index
    %368 = memref.load %arg0[%c16] : memref<32xf32, #tpu.memory_space<smem>>
    %369 = vector.broadcast %368 : f32 to vector<2x8xf32>
    %370 = arith.mulf %369, %1 : vector<2x8xf32>
    %371 = vector.broadcast %368 : f32 to vector<2x8xf32>
    %372 = arith.mulf %371, %9 : vector<2x8xf32>
    %c17 = arith.constant 17 : index
    %373 = memref.load %arg0[%c17] : memref<32xf32, #tpu.memory_space<smem>>
    %374 = vector.broadcast %373 : f32 to vector<2x8xf32>
    %375 = arith.mulf %374, %3 : vector<2x8xf32>
    %376 = arith.addf %370, %375 : vector<2x8xf32>
    %377 = vector.broadcast %373 : f32 to vector<2x8xf32>
    %378 = arith.mulf %377, %11 : vector<2x8xf32>
    %379 = arith.addf %372, %378 : vector<2x8xf32>
    %c18 = arith.constant 18 : index
    %380 = memref.load %arg0[%c18] : memref<32xf32, #tpu.memory_space<smem>>
    %381 = vector.broadcast %380 : f32 to vector<2x8xf32>
    %382 = arith.mulf %381, %5 : vector<2x8xf32>
    %383 = arith.addf %376, %382 : vector<2x8xf32>
    %384 = vector.broadcast %380 : f32 to vector<2x8xf32>
    %385 = arith.mulf %384, %13 : vector<2x8xf32>
    %386 = arith.addf %379, %385 : vector<2x8xf32>
    %c19 = arith.constant 19 : index
    %387 = memref.load %arg0[%c19] : memref<32xf32, #tpu.memory_space<smem>>
    %388 = vector.broadcast %387 : f32 to vector<2x8xf32>
    %389 = arith.mulf %388, %7 : vector<2x8xf32>
    %390 = arith.addf %383, %389 : vector<2x8xf32>
    %391 = vector.broadcast %387 : f32 to vector<2x8xf32>
    %392 = arith.mulf %391, %15 : vector<2x8xf32>
    %393 = arith.addf %386, %392 : vector<2x8xf32>
    %394 = vector.shape_cast %390 : vector<2x8xf32> to vector<1x2x8xf32>
    %cst_87 = arith.constant dense<0.000000e+00> : vector<1xf32>
    %395 = vector.multi_reduction <add>, %394, %cst_87 [1, 2] : vector<1x2x8xf32> to vector<1xf32>
    %396 = vector.shape_cast %395 : vector<1xf32> to vector<1x1x1xf32>
    %397 = vector.extract %396[0, 0, 0] : f32 from vector<1x1x1xf32>
    %398 = vector.broadcast %397 : f32 to vector<1x1xf32>
    %399 = vector.shape_cast %393 : vector<2x8xf32> to vector<1x2x8xf32>
    %cst_88 = arith.constant dense<0.000000e+00> : vector<1xf32>
    %400 = vector.multi_reduction <add>, %399, %cst_88 [1, 2] : vector<1x2x8xf32> to vector<1xf32>
    %401 = vector.shape_cast %400 : vector<1xf32> to vector<1x1x1xf32>
    %402 = vector.extract %401[0, 0, 0] : f32 from vector<1x1x1xf32>
    %403 = vector.broadcast %402 : f32 to vector<1x1xf32>
    %404 = arith.addf %398, %403 : vector<1x1xf32>
    %405 = arith.mulf %390, %390 : vector<2x8xf32>
    %406 = vector.shape_cast %405 : vector<2x8xf32> to vector<1x2x8xf32>
    %cst_89 = arith.constant dense<0.000000e+00> : vector<1xf32>
    %407 = vector.multi_reduction <add>, %406, %cst_89 [1, 2] : vector<1x2x8xf32> to vector<1xf32>
    %408 = vector.shape_cast %407 : vector<1xf32> to vector<1x1x1xf32>
    %409 = vector.extract %408[0, 0, 0] : f32 from vector<1x1x1xf32>
    %410 = vector.broadcast %409 : f32 to vector<1x1xf32>
    %411 = arith.mulf %393, %393 : vector<2x8xf32>
    %412 = vector.shape_cast %411 : vector<2x8xf32> to vector<1x2x8xf32>
    %cst_90 = arith.constant dense<0.000000e+00> : vector<1xf32>
    %413 = vector.multi_reduction <add>, %412, %cst_90 [1, 2] : vector<1x2x8xf32> to vector<1xf32>
    %414 = vector.shape_cast %413 : vector<1xf32> to vector<1x1x1xf32>
    %415 = vector.extract %414[0, 0, 0] : f32 from vector<1x1x1xf32>
    %416 = vector.broadcast %415 : f32 to vector<1x1xf32>
    %417 = arith.addf %410, %416 : vector<1x1xf32>
    %cst_91 = arith.constant 3.125000e-02 : f32
    %418 = vector.broadcast %cst_91 : f32 to vector<1x1xf32>
    %419 = arith.mulf %404, %418 : vector<1x1xf32>
    %cst_92 = arith.constant 3.125000e-02 : f32
    %420 = vector.broadcast %cst_92 : f32 to vector<1x1xf32>
    %421 = arith.mulf %417, %420 : vector<1x1xf32>
    %422 = arith.mulf %419, %419 : vector<1x1xf32>
    %423 = arith.subf %421, %422 : vector<1x1xf32>
    %cst_93 = arith.constant 0.000000e+00 : f32
    %424 = vector.broadcast %cst_93 : f32 to vector<1x1xf32>
    %425 = arith.maximumf %423, %424 : vector<1x1xf32>
    %c4_94 = arith.constant 4 : index
    %426 = memref.load %arg1[%c4_94] : memref<8xf32, #tpu.memory_space<smem>>
    %cst_95 = arith.constant 9.99999974E-6 : f32
    %427 = vector.broadcast %cst_95 : f32 to vector<1x1xf32>
    %428 = arith.addf %425, %427 : vector<1x1xf32>
    %429 = math.rsqrt %428 : vector<1x1xf32>
    %430 = vector.broadcast %426 : f32 to vector<1x1xf32>
    %431 = arith.mulf %430, %429 : vector<1x1xf32>
    %c4_96 = arith.constant 4 : index
    %432 = memref.load %arg2[%c4_96] : memref<8xf32, #tpu.memory_space<smem>>
    %433 = arith.mulf %419, %431 : vector<1x1xf32>
    %434 = vector.broadcast %432 : f32 to vector<1x1xf32>
    %435 = arith.subf %434, %433 : vector<1x1xf32>
    %436 = vector.broadcast %431 : vector<1x1xf32> to vector<2x8xf32>
    %437 = arith.mulf %390, %436 : vector<2x8xf32>
    %438 = vector.broadcast %435 : vector<1x1xf32> to vector<2x8xf32>
    %439 = arith.addf %437, %438 : vector<2x8xf32>
    %cst_97 = arith.constant 0.000000e+00 : f32
    %440 = vector.broadcast %cst_97 : f32 to vector<2x8xf32>
    %441 = arith.maximumf %439, %440 : vector<2x8xf32>
    %442 = vector.broadcast %431 : vector<1x1xf32> to vector<2x8xf32>
    %443 = arith.mulf %393, %442 : vector<2x8xf32>
    %444 = vector.broadcast %435 : vector<1x1xf32> to vector<2x8xf32>
    %445 = arith.addf %443, %444 : vector<2x8xf32>
    %cst_98 = arith.constant 0.000000e+00 : f32
    %446 = vector.broadcast %cst_98 : f32 to vector<2x8xf32>
    %447 = arith.maximumf %445, %446 : vector<2x8xf32>
    %cst_99 = arith.constant 0.000000e+00 : f32
    %448 = vector.broadcast %cst_99 : f32 to vector<2x1xf32>
    %449 = vector.extract_strided_slice %447 {offsets = [0, 0], sizes = [2, 7], strides = [1, 1]} : vector<2x8xf32> to vector<2x7xf32>
    %450 = tpu.concatenate %448, %449 in 1 : vector<2x1xf32>, vector<2x7xf32> -> vector<2x8xf32>
    %451 = arith.maximumf %441, %447 : vector<2x8xf32>
    %452 = arith.maximumf %451, %450 : vector<2x8xf32>
    %c0_100 = arith.constant 0 : index
    %c4_101 = arith.constant 4 : index
    %c0_102 = arith.constant 0 : index
    %453 = vector.load %arg5[%c0_100, %c4_101, %c0_102] : memref<2x8x8xf32, #tpu.memory_space<vmem>>, vector<2x1x8xf32>
    %454 = vector.shape_cast %453 : vector<2x1x8xf32> to vector<2x8xf32>
    %455 = vector.shape_cast %452 : vector<2x8xf32> to vector<2x1x8xf32>
    tpu.vector_store %arg5[%c0_100, %c4_101, %c0_102], %455 {strides = array<i32>} : memref<2x8x8xf32, #tpu.memory_space<vmem>>, vector<2x1x8xf32>,
    %c20 = arith.constant 20 : index
    %456 = memref.load %arg0[%c20] : memref<32xf32, #tpu.memory_space<smem>>
    %457 = vector.broadcast %456 : f32 to vector<2x8xf32>
    %458 = arith.mulf %457, %1 : vector<2x8xf32>
    %459 = vector.broadcast %456 : f32 to vector<2x8xf32>
    %460 = arith.mulf %459, %9 : vector<2x8xf32>
    %c21 = arith.constant 21 : index
    %461 = memref.load %arg0[%c21] : memref<32xf32, #tpu.memory_space<smem>>
    %462 = vector.broadcast %461 : f32 to vector<2x8xf32>
    %463 = arith.mulf %462, %3 : vector<2x8xf32>
    %464 = arith.addf %458, %463 : vector<2x8xf32>
    %465 = vector.broadcast %461 : f32 to vector<2x8xf32>
    %466 = arith.mulf %465, %11 : vector<2x8xf32>
    %467 = arith.addf %460, %466 : vector<2x8xf32>
    %c22 = arith.constant 22 : index
    %468 = memref.load %arg0[%c22] : memref<32xf32, #tpu.memory_space<smem>>
    %469 = vector.broadcast %468 : f32 to vector<2x8xf32>
    %470 = arith.mulf %469, %5 : vector<2x8xf32>
    %471 = arith.addf %464, %470 : vector<2x8xf32>
    %472 = vector.broadcast %468 : f32 to vector<2x8xf32>
    %473 = arith.mulf %472, %13 : vector<2x8xf32>
    %474 = arith.addf %467, %473 : vector<2x8xf32>
    %c23 = arith.constant 23 : index
    %475 = memref.load %arg0[%c23] : memref<32xf32, #tpu.memory_space<smem>>
    %476 = vector.broadcast %475 : f32 to vector<2x8xf32>
    %477 = arith.mulf %476, %7 : vector<2x8xf32>
    %478 = arith.addf %471, %477 : vector<2x8xf32>
    %479 = vector.broadcast %475 : f32 to vector<2x8xf32>
    %480 = arith.mulf %479, %15 : vector<2x8xf32>
    %481 = arith.addf %474, %480 : vector<2x8xf32>
    %482 = vector.shape_cast %478 : vector<2x8xf32> to vector<1x2x8xf32>
    %cst_103 = arith.constant dense<0.000000e+00> : vector<1xf32>
    %483 = vector.multi_reduction <add>, %482, %cst_103 [1, 2] : vector<1x2x8xf32> to vector<1xf32>
    %484 = vector.shape_cast %483 : vector<1xf32> to vector<1x1x1xf32>
    %485 = vector.extract %484[0, 0, 0] : f32 from vector<1x1x1xf32>
    %486 = vector.broadcast %485 : f32 to vector<1x1xf32>
    %487 = vector.shape_cast %481 : vector<2x8xf32> to vector<1x2x8xf32>
    %cst_104 = arith.constant dense<0.000000e+00> : vector<1xf32>
    %488 = vector.multi_reduction <add>, %487, %cst_104 [1, 2] : vector<1x2x8xf32> to vector<1xf32>
    %489 = vector.shape_cast %488 : vector<1xf32> to vector<1x1x1xf32>
    %490 = vector.extract %489[0, 0, 0] : f32 from vector<1x1x1xf32>
    %491 = vector.broadcast %490 : f32 to vector<1x1xf32>
    %492 = arith.addf %486, %491 : vector<1x1xf32>
    %493 = arith.mulf %478, %478 : vector<2x8xf32>
    %494 = vector.shape_cast %493 : vector<2x8xf32> to vector<1x2x8xf32>
    %cst_105 = arith.constant dense<0.000000e+00> : vector<1xf32>
    %495 = vector.multi_reduction <add>, %494, %cst_105 [1, 2] : vector<1x2x8xf32> to vector<1xf32>
    %496 = vector.shape_cast %495 : vector<1xf32> to vector<1x1x1xf32>
    %497 = vector.extract %496[0, 0, 0] : f32 from vector<1x1x1xf32>
    %498 = vector.broadcast %497 : f32 to vector<1x1xf32>
    %499 = arith.mulf %481, %481 : vector<2x8xf32>
    %500 = vector.shape_cast %499 : vector<2x8xf32> to vector<1x2x8xf32>
    %cst_106 = arith.constant dense<0.000000e+00> : vector<1xf32>
    %501 = vector.multi_reduction <add>, %500, %cst_106 [1, 2] : vector<1x2x8xf32> to vector<1xf32>
    %502 = vector.shape_cast %501 : vector<1xf32> to vector<1x1x1xf32>
    %503 = vector.extract %502[0, 0, 0] : f32 from vector<1x1x1xf32>
    %504 = vector.broadcast %503 : f32 to vector<1x1xf32>
    %505 = arith.addf %498, %504 : vector<1x1xf32>
    %cst_107 = arith.constant 3.125000e-02 : f32
    %506 = vector.broadcast %cst_107 : f32 to vector<1x1xf32>
    %507 = arith.mulf %492, %506 : vector<1x1xf32>
    %cst_108 = arith.constant 3.125000e-02 : f32
    %508 = vector.broadcast %cst_108 : f32 to vector<1x1xf32>
    %509 = arith.mulf %505, %508 : vector<1x1xf32>
    %510 = arith.mulf %507, %507 : vector<1x1xf32>
    %511 = arith.subf %509, %510 : vector<1x1xf32>
    %cst_109 = arith.constant 0.000000e+00 : f32
    %512 = vector.broadcast %cst_109 : f32 to vector<1x1xf32>
    %513 = arith.maximumf %511, %512 : vector<1x1xf32>
    %c5_110 = arith.constant 5 : index
    %514 = memref.load %arg1[%c5_110] : memref<8xf32, #tpu.memory_space<smem>>
    %cst_111 = arith.constant 9.99999974E-6 : f32
    %515 = vector.broadcast %cst_111 : f32 to vector<1x1xf32>
    %516 = arith.addf %513, %515 : vector<1x1xf32>
    %517 = math.rsqrt %516 : vector<1x1xf32>
    %518 = vector.broadcast %514 : f32 to vector<1x1xf32>
    %519 = arith.mulf %518, %517 : vector<1x1xf32>
    %c5_112 = arith.constant 5 : index
    %520 = memref.load %arg2[%c5_112] : memref<8xf32, #tpu.memory_space<smem>>
    %521 = arith.mulf %507, %519 : vector<1x1xf32>
    %522 = vector.broadcast %520 : f32 to vector<1x1xf32>
    %523 = arith.subf %522, %521 : vector<1x1xf32>
    %524 = vector.broadcast %519 : vector<1x1xf32> to vector<2x8xf32>
    %525 = arith.mulf %478, %524 : vector<2x8xf32>
    %526 = vector.broadcast %523 : vector<1x1xf32> to vector<2x8xf32>
    %527 = arith.addf %525, %526 : vector<2x8xf32>
    %cst_113 = arith.constant 0.000000e+00 : f32
    %528 = vector.broadcast %cst_113 : f32 to vector<2x8xf32>
    %529 = arith.maximumf %527, %528 : vector<2x8xf32>
    %530 = vector.broadcast %519 : vector<1x1xf32> to vector<2x8xf32>
    %531 = arith.mulf %481, %530 : vector<2x8xf32>
    %532 = vector.broadcast %523 : vector<1x1xf32> to vector<2x8xf32>
    %533 = arith.addf %531, %532 : vector<2x8xf32>
    %cst_114 = arith.constant 0.000000e+00 : f32
    %534 = vector.broadcast %cst_114 : f32 to vector<2x8xf32>
    %535 = arith.maximumf %533, %534 : vector<2x8xf32>
    %cst_115 = arith.constant 0.000000e+00 : f32
    %536 = vector.broadcast %cst_115 : f32 to vector<2x1xf32>
    %537 = vector.extract_strided_slice %535 {offsets = [0, 0], sizes = [2, 7], strides = [1, 1]} : vector<2x8xf32> to vector<2x7xf32>
    %538 = tpu.concatenate %536, %537 in 1 : vector<2x1xf32>, vector<2x7xf32> -> vector<2x8xf32>
    %539 = arith.maximumf %529, %535 : vector<2x8xf32>
    %540 = arith.maximumf %539, %538 : vector<2x8xf32>
    %c0_116 = arith.constant 0 : index
    %c5_117 = arith.constant 5 : index
    %c0_118 = arith.constant 0 : index
    %541 = vector.load %arg5[%c0_116, %c5_117, %c0_118] : memref<2x8x8xf32, #tpu.memory_space<vmem>>, vector<2x1x8xf32>
    %542 = vector.shape_cast %541 : vector<2x1x8xf32> to vector<2x8xf32>
    %543 = vector.shape_cast %540 : vector<2x8xf32> to vector<2x1x8xf32>
    tpu.vector_store %arg5[%c0_116, %c5_117, %c0_118], %543 {strides = array<i32>} : memref<2x8x8xf32, #tpu.memory_space<vmem>>, vector<2x1x8xf32>,
    %c24 = arith.constant 24 : index
    %544 = memref.load %arg0[%c24] : memref<32xf32, #tpu.memory_space<smem>>
    %545 = vector.broadcast %544 : f32 to vector<2x8xf32>
    %546 = arith.mulf %545, %1 : vector<2x8xf32>
    %547 = vector.broadcast %544 : f32 to vector<2x8xf32>
    %548 = arith.mulf %547, %9 : vector<2x8xf32>
    %c25 = arith.constant 25 : index
    %549 = memref.load %arg0[%c25] : memref<32xf32, #tpu.memory_space<smem>>
    %550 = vector.broadcast %549 : f32 to vector<2x8xf32>
    %551 = arith.mulf %550, %3 : vector<2x8xf32>
    %552 = arith.addf %546, %551 : vector<2x8xf32>
    %553 = vector.broadcast %549 : f32 to vector<2x8xf32>
    %554 = arith.mulf %553, %11 : vector<2x8xf32>
    %555 = arith.addf %548, %554 : vector<2x8xf32>
    %c26 = arith.constant 26 : index
    %556 = memref.load %arg0[%c26] : memref<32xf32, #tpu.memory_space<smem>>
    %557 = vector.broadcast %556 : f32 to vector<2x8xf32>
    %558 = arith.mulf %557, %5 : vector<2x8xf32>
    %559 = arith.addf %552, %558 : vector<2x8xf32>
    %560 = vector.broadcast %556 : f32 to vector<2x8xf32>
    %561 = arith.mulf %560, %13 : vector<2x8xf32>
    %562 = arith.addf %555, %561 : vector<2x8xf32>
    %c27 = arith.constant 27 : index
    %563 = memref.load %arg0[%c27] : memref<32xf32, #tpu.memory_space<smem>>
    %564 = vector.broadcast %563 : f32 to vector<2x8xf32>
    %565 = arith.mulf %564, %7 : vector<2x8xf32>
    %566 = arith.addf %559, %565 : vector<2x8xf32>
    %567 = vector.broadcast %563 : f32 to vector<2x8xf32>
    %568 = arith.mulf %567, %15 : vector<2x8xf32>
    %569 = arith.addf %562, %568 : vector<2x8xf32>
    %570 = vector.shape_cast %566 : vector<2x8xf32> to vector<1x2x8xf32>
    %cst_119 = arith.constant dense<0.000000e+00> : vector<1xf32>
    %571 = vector.multi_reduction <add>, %570, %cst_119 [1, 2] : vector<1x2x8xf32> to vector<1xf32>
    %572 = vector.shape_cast %571 : vector<1xf32> to vector<1x1x1xf32>
    %573 = vector.extract %572[0, 0, 0] : f32 from vector<1x1x1xf32>
    %574 = vector.broadcast %573 : f32 to vector<1x1xf32>
    %575 = vector.shape_cast %569 : vector<2x8xf32> to vector<1x2x8xf32>
    %cst_120 = arith.constant dense<0.000000e+00> : vector<1xf32>
    %576 = vector.multi_reduction <add>, %575, %cst_120 [1, 2] : vector<1x2x8xf32> to vector<1xf32>
    %577 = vector.shape_cast %576 : vector<1xf32> to vector<1x1x1xf32>
    %578 = vector.extract %577[0, 0, 0] : f32 from vector<1x1x1xf32>
    %579 = vector.broadcast %578 : f32 to vector<1x1xf32>
    %580 = arith.addf %574, %579 : vector<1x1xf32>
    %581 = arith.mulf %566, %566 : vector<2x8xf32>
    %582 = vector.shape_cast %581 : vector<2x8xf32> to vector<1x2x8xf32>
    %cst_121 = arith.constant dense<0.000000e+00> : vector<1xf32>
    %583 = vector.multi_reduction <add>, %582, %cst_121 [1, 2] : vector<1x2x8xf32> to vector<1xf32>
    %584 = vector.shape_cast %583 : vector<1xf32> to vector<1x1x1xf32>
    %585 = vector.extract %584[0, 0, 0] : f32 from vector<1x1x1xf32>
    %586 = vector.broadcast %585 : f32 to vector<1x1xf32>
    %587 = arith.mulf %569, %569 : vector<2x8xf32>
    %588 = vector.shape_cast %587 : vector<2x8xf32> to vector<1x2x8xf32>
    %cst_122 = arith.constant dense<0.000000e+00> : vector<1xf32>
    %589 = vector.multi_reduction <add>, %588, %cst_122 [1, 2] : vector<1x2x8xf32> to vector<1xf32>
    %590 = vector.shape_cast %589 : vector<1xf32> to vector<1x1x1xf32>
    %591 = vector.extract %590[0, 0, 0] : f32 from vector<1x1x1xf32>
    %592 = vector.broadcast %591 : f32 to vector<1x1xf32>
    %593 = arith.addf %586, %592 : vector<1x1xf32>
    %cst_123 = arith.constant 3.125000e-02 : f32
    %594 = vector.broadcast %cst_123 : f32 to vector<1x1xf32>
    %595 = arith.mulf %580, %594 : vector<1x1xf32>
    %cst_124 = arith.constant 3.125000e-02 : f32
    %596 = vector.broadcast %cst_124 : f32 to vector<1x1xf32>
    %597 = arith.mulf %593, %596 : vector<1x1xf32>
    %598 = arith.mulf %595, %595 : vector<1x1xf32>
    %599 = arith.subf %597, %598 : vector<1x1xf32>
    %cst_125 = arith.constant 0.000000e+00 : f32
    %600 = vector.broadcast %cst_125 : f32 to vector<1x1xf32>
    %601 = arith.maximumf %599, %600 : vector<1x1xf32>
    %c6_126 = arith.constant 6 : index
    %602 = memref.load %arg1[%c6_126] : memref<8xf32, #tpu.memory_space<smem>>
    %cst_127 = arith.constant 9.99999974E-6 : f32
    %603 = vector.broadcast %cst_127 : f32 to vector<1x1xf32>
    %604 = arith.addf %601, %603 : vector<1x1xf32>
    %605 = math.rsqrt %604 : vector<1x1xf32>
    %606 = vector.broadcast %602 : f32 to vector<1x1xf32>
    %607 = arith.mulf %606, %605 : vector<1x1xf32>
    %c6_128 = arith.constant 6 : index
    %608 = memref.load %arg2[%c6_128] : memref<8xf32, #tpu.memory_space<smem>>
    %609 = arith.mulf %595, %607 : vector<1x1xf32>
    %610 = vector.broadcast %608 : f32 to vector<1x1xf32>
    %611 = arith.subf %610, %609 : vector<1x1xf32>
    %612 = vector.broadcast %607 : vector<1x1xf32> to vector<2x8xf32>
    %613 = arith.mulf %566, %612 : vector<2x8xf32>
    %614 = vector.broadcast %611 : vector<1x1xf32> to vector<2x8xf32>
    %615 = arith.addf %613, %614 : vector<2x8xf32>
    %cst_129 = arith.constant 0.000000e+00 : f32
    %616 = vector.broadcast %cst_129 : f32 to vector<2x8xf32>
    %617 = arith.maximumf %615, %616 : vector<2x8xf32>
    %618 = vector.broadcast %607 : vector<1x1xf32> to vector<2x8xf32>
    %619 = arith.mulf %569, %618 : vector<2x8xf32>
    %620 = vector.broadcast %611 : vector<1x1xf32> to vector<2x8xf32>
    %621 = arith.addf %619, %620 : vector<2x8xf32>
    %cst_130 = arith.constant 0.000000e+00 : f32
    %622 = vector.broadcast %cst_130 : f32 to vector<2x8xf32>
    %623 = arith.maximumf %621, %622 : vector<2x8xf32>
    %cst_131 = arith.constant 0.000000e+00 : f32
    %624 = vector.broadcast %cst_131 : f32 to vector<2x1xf32>
    %625 = vector.extract_strided_slice %623 {offsets = [0, 0], sizes = [2, 7], strides = [1, 1]} : vector<2x8xf32> to vector<2x7xf32>
    %626 = tpu.concatenate %624, %625 in 1 : vector<2x1xf32>, vector<2x7xf32> -> vector<2x8xf32>
    %627 = arith.maximumf %617, %623 : vector<2x8xf32>
    %628 = arith.maximumf %627, %626 : vector<2x8xf32>
    %c0_132 = arith.constant 0 : index
    %c6_133 = arith.constant 6 : index
    %c0_134 = arith.constant 0 : index
    %629 = vector.load %arg5[%c0_132, %c6_133, %c0_134] : memref<2x8x8xf32, #tpu.memory_space<vmem>>, vector<2x1x8xf32>
    %630 = vector.shape_cast %629 : vector<2x1x8xf32> to vector<2x8xf32>
    %631 = vector.shape_cast %628 : vector<2x8xf32> to vector<2x1x8xf32>
    tpu.vector_store %arg5[%c0_132, %c6_133, %c0_134], %631 {strides = array<i32>} : memref<2x8x8xf32, #tpu.memory_space<vmem>>, vector<2x1x8xf32>,
    %c28 = arith.constant 28 : index
    %632 = memref.load %arg0[%c28] : memref<32xf32, #tpu.memory_space<smem>>
    %633 = vector.broadcast %632 : f32 to vector<2x8xf32>
    %634 = arith.mulf %633, %1 : vector<2x8xf32>
    %635 = vector.broadcast %632 : f32 to vector<2x8xf32>
    %636 = arith.mulf %635, %9 : vector<2x8xf32>
    %c29 = arith.constant 29 : index
    %637 = memref.load %arg0[%c29] : memref<32xf32, #tpu.memory_space<smem>>
    %638 = vector.broadcast %637 : f32 to vector<2x8xf32>
    %639 = arith.mulf %638, %3 : vector<2x8xf32>
    %640 = arith.addf %634, %639 : vector<2x8xf32>
    %641 = vector.broadcast %637 : f32 to vector<2x8xf32>
    %642 = arith.mulf %641, %11 : vector<2x8xf32>
    %643 = arith.addf %636, %642 : vector<2x8xf32>
    %c30 = arith.constant 30 : index
    %644 = memref.load %arg0[%c30] : memref<32xf32, #tpu.memory_space<smem>>
    %645 = vector.broadcast %644 : f32 to vector<2x8xf32>
    %646 = arith.mulf %645, %5 : vector<2x8xf32>
    %647 = arith.addf %640, %646 : vector<2x8xf32>
    %648 = vector.broadcast %644 : f32 to vector<2x8xf32>
    %649 = arith.mulf %648, %13 : vector<2x8xf32>
    %650 = arith.addf %643, %649 : vector<2x8xf32>
    %c31 = arith.constant 31 : index
    %651 = memref.load %arg0[%c31] : memref<32xf32, #tpu.memory_space<smem>>
    %652 = vector.broadcast %651 : f32 to vector<2x8xf32>
    %653 = arith.mulf %652, %7 : vector<2x8xf32>
    %654 = arith.addf %647, %653 : vector<2x8xf32>
    %655 = vector.broadcast %651 : f32 to vector<2x8xf32>
    %656 = arith.mulf %655, %15 : vector<2x8xf32>
    %657 = arith.addf %650, %656 : vector<2x8xf32>
    %658 = vector.shape_cast %654 : vector<2x8xf32> to vector<1x2x8xf32>
    %cst_135 = arith.constant dense<0.000000e+00> : vector<1xf32>
    %659 = vector.multi_reduction <add>, %658, %cst_135 [1, 2] : vector<1x2x8xf32> to vector<1xf32>
    %660 = vector.shape_cast %659 : vector<1xf32> to vector<1x1x1xf32>
    %661 = vector.extract %660[0, 0, 0] : f32 from vector<1x1x1xf32>
    %662 = vector.broadcast %661 : f32 to vector<1x1xf32>
    %663 = vector.shape_cast %657 : vector<2x8xf32> to vector<1x2x8xf32>
    %cst_136 = arith.constant dense<0.000000e+00> : vector<1xf32>
    %664 = vector.multi_reduction <add>, %663, %cst_136 [1, 2] : vector<1x2x8xf32> to vector<1xf32>
    %665 = vector.shape_cast %664 : vector<1xf32> to vector<1x1x1xf32>
    %666 = vector.extract %665[0, 0, 0] : f32 from vector<1x1x1xf32>
    %667 = vector.broadcast %666 : f32 to vector<1x1xf32>
    %668 = arith.addf %662, %667 : vector<1x1xf32>
    %669 = arith.mulf %654, %654 : vector<2x8xf32>
    %670 = vector.shape_cast %669 : vector<2x8xf32> to vector<1x2x8xf32>
    %cst_137 = arith.constant dense<0.000000e+00> : vector<1xf32>
    %671 = vector.multi_reduction <add>, %670, %cst_137 [1, 2] : vector<1x2x8xf32> to vector<1xf32>
    %672 = vector.shape_cast %671 : vector<1xf32> to vector<1x1x1xf32>
    %673 = vector.extract %672[0, 0, 0] : f32 from vector<1x1x1xf32>
    %674 = vector.broadcast %673 : f32 to vector<1x1xf32>
    %675 = arith.mulf %657, %657 : vector<2x8xf32>
    %676 = vector.shape_cast %675 : vector<2x8xf32> to vector<1x2x8xf32>
    %cst_138 = arith.constant dense<0.000000e+00> : vector<1xf32>
    %677 = vector.multi_reduction <add>, %676, %cst_138 [1, 2] : vector<1x2x8xf32> to vector<1xf32>
    %678 = vector.shape_cast %677 : vector<1xf32> to vector<1x1x1xf32>
    %679 = vector.extract %678[0, 0, 0] : f32 from vector<1x1x1xf32>
    %680 = vector.broadcast %679 : f32 to vector<1x1xf32>
    %681 = arith.addf %674, %680 : vector<1x1xf32>
    %cst_139 = arith.constant 3.125000e-02 : f32
    %682 = vector.broadcast %cst_139 : f32 to vector<1x1xf32>
    %683 = arith.mulf %668, %682 : vector<1x1xf32>
    %cst_140 = arith.constant 3.125000e-02 : f32
    %684 = vector.broadcast %cst_140 : f32 to vector<1x1xf32>
    %685 = arith.mulf %681, %684 : vector<1x1xf32>
    %686 = arith.mulf %683, %683 : vector<1x1xf32>
    %687 = arith.subf %685, %686 : vector<1x1xf32>
    %cst_141 = arith.constant 0.000000e+00 : f32
    %688 = vector.broadcast %cst_141 : f32 to vector<1x1xf32>
    %689 = arith.maximumf %687, %688 : vector<1x1xf32>
    %c7_142 = arith.constant 7 : index
    %690 = memref.load %arg1[%c7_142] : memref<8xf32, #tpu.memory_space<smem>>
    %cst_143 = arith.constant 9.99999974E-6 : f32
    %691 = vector.broadcast %cst_143 : f32 to vector<1x1xf32>
    %692 = arith.addf %689, %691 : vector<1x1xf32>
    %693 = math.rsqrt %692 : vector<1x1xf32>
    %694 = vector.broadcast %690 : f32 to vector<1x1xf32>
    %695 = arith.mulf %694, %693 : vector<1x1xf32>
    %c7_144 = arith.constant 7 : index
    %696 = memref.load %arg2[%c7_144] : memref<8xf32, #tpu.memory_space<smem>>
    %697 = arith.mulf %683, %695 : vector<1x1xf32>
    %698 = vector.broadcast %696 : f32 to vector<1x1xf32>
    %699 = arith.subf %698, %697 : vector<1x1xf32>
    %700 = vector.broadcast %695 : vector<1x1xf32> to vector<2x8xf32>
    %701 = arith.mulf %654, %700 : vector<2x8xf32>
    %702 = vector.broadcast %699 : vector<1x1xf32> to vector<2x8xf32>
    %703 = arith.addf %701, %702 : vector<2x8xf32>
    %cst_145 = arith.constant 0.000000e+00 : f32
    %704 = vector.broadcast %cst_145 : f32 to vector<2x8xf32>
    %705 = arith.maximumf %703, %704 : vector<2x8xf32>
    %706 = vector.broadcast %695 : vector<1x1xf32> to vector<2x8xf32>
    %707 = arith.mulf %657, %706 : vector<2x8xf32>
    %708 = vector.broadcast %699 : vector<1x1xf32> to vector<2x8xf32>
    %709 = arith.addf %707, %708 : vector<2x8xf32>
    %cst_146 = arith.constant 0.000000e+00 : f32
    %710 = vector.broadcast %cst_146 : f32 to vector<2x8xf32>
    %711 = arith.maximumf %709, %710 : vector<2x8xf32>
    %cst_147 = arith.constant 0.000000e+00 : f32
    %712 = vector.broadcast %cst_147 : f32 to vector<2x1xf32>
    %713 = vector.extract_strided_slice %711 {offsets = [0, 0], sizes = [2, 7], strides = [1, 1]} : vector<2x8xf32> to vector<2x7xf32>
    %714 = tpu.concatenate %712, %713 in 1 : vector<2x1xf32>, vector<2x7xf32> -> vector<2x8xf32>
    %715 = arith.maximumf %705, %711 : vector<2x8xf32>
    %716 = arith.maximumf %715, %714 : vector<2x8xf32>
    %c0_148 = arith.constant 0 : index
    %c7_149 = arith.constant 7 : index
    %c0_150 = arith.constant 0 : index
    %717 = vector.load %arg5[%c0_148, %c7_149, %c0_150] : memref<2x8x8xf32, #tpu.memory_space<vmem>>, vector<2x1x8xf32>
    %718 = vector.shape_cast %717 : vector<2x1x8xf32> to vector<2x8xf32>
    %719 = vector.shape_cast %716 : vector<2x8xf32> to vector<2x1x8xf32>
    tpu.vector_store %arg5[%c0_148, %c7_149, %c0_150], %719 {strides = array<i32>} : memref<2x8x8xf32, #tpu.memory_space<vmem>>, vector<2x1x8xf32>,
    return
  }
}

</mosaic_0001>

<bundles_post_ra>
// kernel: branch6_forward.1
= control target key start
LH: loop header
LB: loop body
LE: loop exit
PB: predicated region body
PF: predicated region fallthrough
CT: control target
= control target key end

     0   :  { %10 = vsyncpa [#allocation4], 0  ;;  %s2377_s0 = inlined_call_operand.vmem [shape: f32[32], index: 0, kind: input, shape index: {}]   ;;  %s2378_s1 = inlined_call_operand.vmem [shape: f32[8], index: 1, kind: input, shape index: {}]   ;;  %s2379_s2 = inlined_call_operand.vmem [shape: f32[8], index: 2, kind: input, shape index: {}]   ;;  %s2380_s3 = inlined_call_operand.vmem [shape: f32[2,4,8], index: 3, kind: input, shape index: {}]   ;;  %s2381_s4 = inlined_call_operand.vmem [shape: f32[2,4,8], index: 4, kind: input, shape index: {}]   ;;  %s2382_s5 = inlined_call_operand.hbm [shape: f32[2,8,8], index: 5, kind: output, shape index: {}]  }
   0x1   :  { %11 = vsyncpa [#allocation6], 0  ;;  %s27_s20 = sshll.u32 %s2378_s1, 4  ;;  %s28_s20 = int_to_ptr.vmem [resolvable:$true] %s27_s20 }
   0x2   :  { %12 = vsyncpa [#allocation3], 0  ;;  %s18_s23 = sshll.u32 %s2377_s0, 4  ;;  %s1567_s24 = smov [#allocation5]   ;;  %s19_s23 = int_to_ptr.vmem [resolvable:$true] %s18_s23 }
   0x3   :  { %30 = dma.vmem_to_smem %s28_s20, 16, %s1567_s24, [#allocation6]  }
   0x4   :  { %s1568_s25 = smov [#allocation2]   ;;  %s36_s28 = sshll.u32 %s2379_s2, 4  ;;  %s37_s28 = int_to_ptr.vmem [resolvable:$true] %s36_s28 }
   0x5   :  { %21 = dma.vmem_to_smem %s19_s23, 16, %s1568_s25, [#allocation4]  }
   0x6   :  { %s1569_s29 = smov [#allocation7]  }
   0x7   :  { %39 = dma.vmem_to_smem %s37_s28, 16, %s1569_s29, [#allocation6]  }
   0x8   :  { %1561 = dma.done.wait [#allocation4], 16  }
   0x9   :  { %1562 = vsyncadd [#allocation4], 4294967280 }
   0xa   :  { %1563 = dma.done.wait [#allocation6], 32  }
   0xb   :  { %1564 = vsyncadd [#allocation6], 4294967264 }
   0xc   :  { %56 = sfence }
   0xd   :  { %s73_s1 = sld [smem:[#allocation2]]  ;;  %v1616_v0 = vld [vmem:[%s2380_s3] sm:$0x1]  ;;  %v1621_v1 = vld [vmem:[%s2380_s3 + $0x4] sm:$0x1]  ;;  %vm112_vm0 = vcmask 1041409  }
   0xe   :  { %s1369_s30 = sld [smem:[#allocation2 + $0x1]]  ;;  %v1626_v2 = vld [vmem:[%s2380_s3 + $0x1] sm:$0x1]  ;;  %v1631_v3 = vld [vmem:[%s2380_s3 + $0x5] sm:$0x1]  ;;  %vm115_vm1 = vcmask 58368  }
   0xf   :  { %s1370_s0 = sld [smem:[#allocation2 + $0x2]]  ;;  %v1636_v4 = vld [vmem:[%s2381_s4] sm:$0x1]  ;;  %v1641_v5 = vld [vmem:[%s2380_s3 + $0x2] sm:$0x1] }
  0x10   :  { %s1371_s2 = sld [smem:[#allocation2 + $0x3]]  ;;  %v1646_v6 = vld [vmem:[%s2381_s4 + $0x4] sm:$0x1]  ;;  %v1653_v7 = vld [vmem:[%s2380_s3 + $0x6] sm:$0x1] }
  0x11   :  { %s1648_s20 = sld [smem:[#allocation2 + $0x4]]  ;;  %v1658_v9 = vld [vmem:[%s2381_s4 + $0x1] sm:$0x1]  ;;  %v1665_v10 = vld [vmem:[%s2380_s3 + $0x3] sm:$0x1] }
  0x12   :  { %s1660_s25 = sld [smem:[#allocation2 + $0x5]]  ;;  %v1670_v11 = vld [vmem:[%s2380_s3 + $0x7] sm:$0x1]  ;;  %v1677_v15 = vld [vmem:[%s2381_s4 + $0x5] sm:$0x1] }
  0x13   :  { %v74_v8 = vstv %s73_s1  ;;  %v1685_v20 = vld [vmem:[%s2381_s4 + $0x2] sm:$0x1]  ;;  %v1690_v21 = vld [vmem:[%s2381_s4 + $0x6] sm:$0x1]  ;;  %s1693_s9 = sld [smem:[#allocation2 + $0x6]] }
  0x14   :  { %v75_v12 = vmul.f32 %v74_v8, %v1616_v0  ;;  %v76_v13 = vmul.f32 %v74_v8, %v1621_v1  ;;  %v80_v14 = vstv %s1369_s30  ;;  %v77_v16 = vmul.f32 %v74_v8, %v1636_v4  ;;  %v1700_v26 = vld [vmem:[%s2381_s4 + $0x3] sm:$0x1]  ;;  %v1705_v27 = vld [vmem:[%s2381_s4 + $0x7] sm:$0x1]  ;;  %s1739_s4 = sld [smem:[#allocation2 + $0x8]] }
  0x15   :  { %v81_v17 = vmul.f32 %v80_v14, %v1626_v2  ;;  %v82_v18 = vmul.f32 %v80_v14, %v1631_v3  ;;  %v90_v19 = vstv %s1370_s0  ;;  %v78_v22 = vmul.f32 %v74_v8, %v1646_v6  ;;  %s1745_s13 = sld [smem:[#allocation2 + $0x9]] }
  0x16   :  { %v91_v23 = vmul.f32 %v90_v19, %v1641_v5  ;;  %v92_v24 = vmul.f32 %v90_v19, %v1653_v7  ;;  %v100_v25 = vstv %s1371_s2  ;;  %v85_v28 = vmul.f32 %v80_v14, %v1658_v9  ;;  %s1713_s2 = sld [smem:[#allocation2 + $0x7]] }
  0x17   :  { %v83_v29 = vadd.f32 %v81_v17, %v75_v12  ;;  %v84_v30 = vadd.f32 %v82_v18, %v76_v13  ;;  %v101_v31 = vmul.f32 %v100_v25, %v1665_v10  ;;  %v102_v32 = vmul.f32 %v100_v25, %v1670_v11  ;;  %s1758_s14 = sld [smem:[#allocation2 + $0xa]] }
  0x18   :  { %v86_v33 = vmul.f32 %v80_v14, %v1677_v15  ;;  %v87_v34 = vadd.f32 %v85_v28, %v77_v16  ;;  %v95_v35 = vmul.f32 %v90_v19, %v1685_v20  ;;  %v96_v36 = vmul.f32 %v90_v19, %v1690_v21  ;;  %s1774_s15 = sld [smem:[#allocation2 + $0xb]] }
  0x19   :  { %v93_v37 = vadd.f32 %v91_v23, %v83_v29  ;;  %v94_v38 = vadd.f32 %v92_v24, %v84_v30  ;;  %v105_v39 = vmul.f32 %v100_v25, %v1700_v26  ;;  %v106_v40 = vmul.f32 %v100_v25, %v1705_v27  ;;  %s1798_s16 = sld [smem:[#allocation2 + $0xc]] }
  0x1a   :  { %v88_v41 = vadd.f32 %v86_v33, %v78_v22  ;;  %v97_v42 = vadd.f32 %v95_v35, %v87_v34  ;;  %v237_v43 = vstv %s1648_s20  ;;  %v243_v44 = vstv %s1660_s25  ;;  %s1806_s17 = sld [smem:[#allocation2 + $0xd]] }
  0x1b   :  { %v1719_v45 = vadd.f32 %v101_v31, %v93_v37  ;;  %v1721_v46 = vadd.f32 %v102_v32, %v94_v38  ;;  %v238_v47 = vmul.f32 %v237_v43, %v1616_v0  ;;  %v239_v48 = vmul.f32 %v237_v43, %v1621_v1  ;;  %s1814_s18 = sld [smem:[#allocation2 + $0xe]] }
  0x1c   :  { %v98_v49 = vadd.f32 %v96_v36, %v88_v41  ;;  %v1725_v50 = vadd.f32 %v105_v39, %v97_v42  ;;  %v244_v51 = vmul.f32 %v243_v44, %v1626_v2  ;;  %v245_v52 = vmul.f32 %v243_v44, %v1631_v3  ;;  %s1828_s19 = sld [smem:[#allocation2 + $0xf]] }
  0x1d   :  { %v111_v53 = vrot.slane %v1721_v46, 7  ;;  %v144_v54 = vmul.f32 %v1719_v45, %v1719_v45  ;;  %v145_v55 = vmul.f32 %v1721_v46, %v1721_v46  ;;  %v253_v56 = vstv %s1693_s9  ;;  %s1854_s20 = sld [smem:[#allocation2 + $0x10]] }
  0x1e   :  { %v1735_v57 = vadd.f32 %v106_v40, %v98_v49  ;;  %v162_v58 = vmul.f32 %v1725_v50, %v1725_v50  ;;  %v246_v59 = vadd.f32 %v244_v51, %v238_v47  ;;  %v247_v60 = vadd.f32 %v245_v52, %v239_v48  ;;  %s1861_s21 = sld [smem:[#allocation2 + $0x11]] }
  0x1f   :  { %v113_v61 = vsel %vm112_vm0, %v111_v53, %v1719_v45  ;;  %v148_v62 = vrot.slane %v145_v55, 7  ;;  %v254_v63 = vmul.f32 %v253_v56, %v1641_v5  ;;  %v255_v8 = vmul.f32 %v253_v56, %v1653_v7  ;;  %s1870_s22 = sld [smem:[#allocation2 + $0x12]] }
  0x20   :  { %v116_v12 = vsel %vm115_vm1, %v113_v61, 0.0  ;;  %v129_v13 = vrot.slane %v1735_v57, 7  ;;  %v163_v14 = vmul.f32 %v1735_v57, %v1735_v57  ;;  %v263_v16 = vstv %s1713_s2  ;;  %s1884_s23 = sld [smem:[#allocation2 + $0x13]] }
  0x21   :  { %117 = vadd.xlane.f32.xlu0 %v116_v12  ;;  %v149_v17 = vsel %vm112_vm0, %v148_v62, %v144_v54  ;;  %v256_v18 = vadd.f32 %v254_v63, %v246_v59  ;;  %v257_v19 = vadd.f32 %v255_v8, %v247_v60  ;;  %v264_v22 = vmul.f32 %v263_v16, %v1665_v10  ;;  %s1910_s24 = sld [smem:[#allocation2 + $0x14]] }
  0x22   :  { %v151_v23 = vsel %vm115_vm1, %v149_v17, 0.0  ;;  %v130_v24 = vsel %vm112_vm0, %v129_v13, %v1725_v50  ;;  %v166_v25 = vrot.slane %v163_v14, 7  ;;  %v265_v28 = vmul.f32 %v263_v16, %v1670_v11  ;;  %s1917_s25 = sld [smem:[#allocation2 + $0x15]] }
  0x23   :  { %152 = vadd.xlane.f32.xlu1 %v151_v23  ;;  %v132_v29 = vsel %vm115_vm1, %v130_v24, 0.0  ;;  %v1761_v30 = vadd.f32 %v264_v22, %v256_v18  ;;  %v240_v31 = vmul.f32 %v237_v43, %v1636_v4  ;;  %v241_v32 = vmul.f32 %v237_v43, %v1646_v6  ;;  %s1925_s26 = sld [smem:[#allocation2 + $0x16]] }
  0x24   :  { %v167_v33 = vsel %vm112_vm0, %v166_v25, %v162_v58  ;;  %v1766_v34 = vadd.f32 %v265_v28, %v257_v19  ;;  %v248_v35 = vmul.f32 %v243_v44, %v1658_v9  ;;  %v249_v36 = vmul.f32 %v243_v44, %v1677_v15  ;;  %s1940_s27 = sld [smem:[#allocation2 + $0x17]] }
  0x25   :  { %v169_v37 = vsel %vm115_vm1, %v167_v33, 0.0  ;;  %v258_v38 = vmul.f32 %v253_v56, %v1685_v20  ;;  %v259_v39 = vmul.f32 %v253_v56, %v1690_v21  ;;  %v268_v40 = vmul.f32 %v263_v16, %v1700_v26  ;;  %s1957_s28 = sld [smem:[#allocation2 + $0x18]] }
  0x26   :  { %v274_v41 = vrot.slane %v1766_v34, 7  ;;  %v250_v42 = vadd.f32 %v248_v35, %v240_v31  ;;  %v251_v43 = vadd.f32 %v249_v36, %v241_v32  ;;  %v269_v47 = vmul.f32 %v263_v16, %v1705_v27  ;;  %s1965_s29 = sld [smem:[#allocation2 + $0x19]] }
  0x27   :  { %v305_v48 = vmul.f32 %v1761_v30, %v1761_v30  ;;  %v306_v44 = vmul.f32 %v1766_v34, %v1766_v34  ;;  %v396_v49 = vstv %s1739_s4  ;;  %v402_v51 = vstv %s1745_s13  ;;  %s1971_s1 = sld [smem:[#allocation2 + $0x1a]] }
  0x28   :  { %v275_v52 = vsel %vm112_vm0, %v274_v41, %v1761_v30  ;;  %v260_v53 = vadd.f32 %v258_v38, %v250_v42  ;;  %v261_v54 = vadd.f32 %v259_v39, %v251_v43  ;;  %v397_v55 = vmul.f32 %v396_v49, %v1616_v0  ;;  %s1977_s6 = sld [smem:[#allocation2 + $0x1b]] }
  0x29   :  { %133 = vadd.xlane.f32.xlu0 %v132_v29  ;;  %v277_v56 = vsel %vm115_vm1, %v275_v52, 0.0  ;;  %v309_v58 = vrot.slane %v306_v44, 7  ;;  %v398_v59 = vmul.f32 %v396_v49, %v1621_v1  ;;  %v403_v60 = vmul.f32 %v402_v51, %v1626_v2  ;;  %s2013_s3 = sld [smem:[#allocation2 + $0x1c]] }
  0x2a   :  { %278 = vadd.xlane.f32.xlu2 %v277_v56  ;;  %v1790_v61 = vadd.f32 %v268_v40, %v260_v53  ;;  %v1792_v62 = vadd.f32 %v269_v47, %v261_v54  ;;  %v404_v63 = vmul.f32 %v402_v51, %v1631_v3  ;;  %v412_v8 = vstv %s1758_s14  ;;  %s2028_s7 = sld [smem:[#allocation2 + $0x1d]] }
  0x2b   :  { %170 = vadd.xlane.f32.xlu1 %v169_v37  ;;  %v405_v12 = vadd.f32 %v403_v60, %v397_v55  ;;  %v413_v13 = vmul.f32 %v412_v8, %v1641_v5  ;;  %v414_v14 = vmul.f32 %v412_v8, %v1653_v7  ;;  %v310_v17 = vsel %vm112_vm0, %v309_v58, %v305_v48  ;;  %s2034_s30 = sld [smem:[#allocation2 + $0x1e]] }
  0x2c   :  { %v290_v16 = vrot.slane %v1792_v62, 7  ;;  %v323_v18 = vmul.f32 %v1790_v61, %v1790_v61  ;;  %v324_v19 = vmul.f32 %v1792_v62, %v1792_v62  ;;  %v406_v22 = vadd.f32 %v404_v63, %v398_v59  ;;  %s2045_s8 = sld [smem:[#allocation2 + $0x1f]] }
  0x2d   :  { %v415_v23 = vadd.f32 %v413_v13, %v405_v12  ;;  %v422_v24 = vstv %s1774_s15  ;;  %v399_v25 = vmul.f32 %v396_v49, %v1636_v4  ;;  %v400_v36 = vmul.f32 %v396_v49, %v1646_v6  ;;  %s2138_s14 = sld [smem:[#allocation5]] }
  0x2e   :  { %v291_v28 = vsel %vm112_vm0, %v290_v16, %v1790_v61  ;;  %v327_v29 = vrot.slane %v324_v19, 7  ;;  %v423_v31 = vmul.f32 %v422_v24, %v1665_v10  ;;  %v424_v32 = vmul.f32 %v422_v24, %v1670_v11 }
  0x2f   :  { %v293_v33 = vsel %vm115_vm1, %v291_v28, 0.0  ;;  %v416_v35 = vadd.f32 %v414_v14, %v406_v22  ;;  %v407_v37 = vmul.f32 %v402_v51, %v1658_v9  ;;  %v312_v38 = vsel %vm115_vm1, %v310_v17, 0.0 }
  0x30   :  { %v1820_v39 = vadd.f32 %v423_v31, %v415_v23  ;;  %v408_v40 = vmul.f32 %v402_v51, %v1677_v15  ;;  %v417_v41 = vmul.f32 %v412_v8, %v1685_v20  ;;  %v328_v42 = vsel %vm112_vm0, %v327_v29, %v323_v18 }
  0x31   :  { %294 = vadd.xlane.f32.xlu0 %v293_v33  ;;  %v1825_v43 = vadd.f32 %v424_v32, %v416_v35  ;;  %v409_v47 = vadd.f32 %v407_v37, %v399_v25  ;;  %v418_v48 = vmul.f32 %v412_v8, %v1690_v21  ;;  %v427_v49 = vmul.f32 %v422_v24, %v1700_v26 }
  0x32   :  { %v410_v44 = vadd.f32 %v408_v40, %v400_v36  ;;  %v428_v52 = vmul.f32 %v422_v24, %v1705_v27  ;;  %v464_v51 = vmul.f32 %v1820_v39, %v1820_v39  ;;  %v555_v56 = vstv %s1798_s16 }
  0x33   :  { %313 = vadd.xlane.f32.xlu1 %v312_v38  ;;  %v433_v53 = vrot.slane %v1825_v43, 7  ;;  %v419_v54 = vadd.f32 %v417_v41, %v409_v47  ;;  %v465_v55 = vmul.f32 %v1825_v43, %v1825_v43  ;;  %v556_v59 = vmul.f32 %v555_v56, %v1616_v0 }
  0x34   :  { %v420_v58 = vadd.f32 %v418_v48, %v410_v44  ;;  %v557_v60 = vmul.f32 %v555_v56, %v1621_v1  ;;  %v561_v63 = vstv %s1806_s17  ;;  %v330_v8 = vsel %vm115_vm1, %v328_v42, 0.0  ;;  %s2143_s17 = sld [smem:[#allocation7]] }
  0x35   :  { %v434_v12 = vsel %vm112_vm0, %v433_v53, %v1820_v39  ;;  %v468_v13 = vrot.slane %v465_v55, 7  ;;  %v562_v14 = vmul.f32 %v561_v63, %v1626_v2  ;;  %v1845_v16 = vadd.f32 %v427_v49, %v419_v54 }
  0x36   :  { %v1847_v17 = vadd.f32 %v428_v52, %v420_v58  ;;  %v563_v18 = vmul.f32 %v561_v63, %v1631_v3  ;;  %v571_v19 = vstv %s1814_s18  ;;  %v436_v22 = vsel %vm115_vm1, %v434_v12, 0.0 }
  0x37   :  { %v469_v23 = vsel %vm112_vm0, %v468_v13, %v464_v51  ;;  %v564_v24 = vadd.f32 %v562_v14, %v556_v59  ;;  %v572_v25 = vmul.f32 %v571_v19, %v1641_v5  ;;  %v482_v29 = vmul.f32 %v1845_v16, %v1845_v16 }
  0x38   :  { %v449_v28 = vrot.slane %v1847_v17, 7  ;;  %v483_v31 = vmul.f32 %v1847_v17, %v1847_v17  ;;  %v565_v32 = vadd.f32 %v563_v18, %v557_v60  ;;  %v573_v33 = vmul.f32 %v571_v19, %v1653_v7 }
  0x39   :  { %331 = vadd.xlane.f32.xlu0 %v330_v8  ;;  %v574_v35 = vadd.f32 %v572_v25, %v564_v24  ;;  %v581_v36 = vstv %s1828_s19  ;;  %v558_v37 = vmul.f32 %v555_v56, %v1636_v4  ;;  %v471_v47 = vsel %vm115_vm1, %v469_v23, 0.0  ;;  %s2151_s19 = sld [smem:[#allocation5 + $0x1]] }
  0x3a   :  { %v450_v38 = vsel %vm112_vm0, %v449_v28, %v1845_v16  ;;  %v486_v40 = vrot.slane %v483_v31, 7  ;;  %v582_v41 = vmul.f32 %v581_v36, %v1665_v10  ;;  %v583_v42 = vmul.f32 %v581_v36, %v1670_v11 }
  0x3b   :  { %437 = vadd.xlane.f32.xlu1 %v436_v22  ;;  %v575_v48 = vadd.f32 %v573_v33, %v565_v32  ;;  %v559_v44 = vmul.f32 %v555_v56, %v1646_v6  ;;  %v566_v49 = vmul.f32 %v561_v63, %v1658_v9  ;;  %v452_v52 = vsel %vm115_vm1, %v450_v38, 0.0 }
  0x3c   :  { %v1876_v51 = vadd.f32 %v582_v41, %v574_v35  ;;  %v567_v53 = vmul.f32 %v561_v63, %v1677_v15  ;;  %v576_v54 = vmul.f32 %v571_v19, %v1685_v20  ;;  %v487_v55 = vsel %vm112_vm0, %v486_v40, %v482_v29 }
  0x3d   :  { %v1881_v58 = vadd.f32 %v583_v42, %v575_v48  ;;  %v568_v59 = vadd.f32 %v566_v49, %v558_v37  ;;  %v577_v60 = vmul.f32 %v571_v19, %v1690_v21  ;;  %v586_v8 = vmul.f32 %v581_v36, %v1700_v26 }
  0x3e   :  { %v569_v56 = vadd.f32 %v567_v53, %v559_v44  ;;  %v587_v12 = vmul.f32 %v581_v36, %v1705_v27  ;;  %v623_v63 = vmul.f32 %v1876_v51, %v1876_v51  ;;  %v714_v22 = vstv %s1854_s20 }
  0x3f   :  { %v592_v13 = vrot.slane %v1881_v58, 7  ;;  %v578_v14 = vadd.f32 %v576_v54, %v568_v59  ;;  %v624_v18 = vmul.f32 %v1881_v58, %v1881_v58  ;;  %v715_v19 = vmul.f32 %v714_v22, %v1616_v0 }
  0x40   :  { %v579_v23 = vadd.f32 %v577_v60, %v569_v56  ;;  %v716_v24 = vmul.f32 %v714_v22, %v1621_v1  ;;  %v720_v25 = vstv %s1861_s21  ;;  %v489_v33 = vsel %vm115_vm1, %v487_v55, 0.0 }
  0x41   :  { %453 = vadd.xlane.f32.xlu0 %v452_v52  ;;  %v593_v28 = vsel %vm112_vm0, %v592_v13, %v1876_v51  ;;  %v1899_v29 = vadd.f32 %v586_v8, %v578_v14  ;;  %v627_v31 = vrot.slane %v624_v18, 7  ;;  %v721_v32 = vmul.f32 %v720_v25, %v1626_v2 }
  0x42   :  { %v1903_v35 = vadd.f32 %v587_v12, %v579_v23  ;;  %v722_v36 = vmul.f32 %v720_v25, %v1631_v3  ;;  %v730_v37 = vstv %s1870_s22  ;;  %v595_v38 = vsel %vm115_vm1, %v593_v28, 0.0  ;;  %s2165_s22 = sld [smem:[#allocation7 + $0x1]] }
  0x43   :  { %472 = vadd.xlane.f32.xlu1 %v471_v47  ;;  %v628_v40 = vsel %vm112_vm0, %v627_v31, %v623_v63  ;;  %v723_v41 = vadd.f32 %v721_v32, %v715_v19  ;;  %v731_v42 = vmul.f32 %v730_v37, %v1641_v5  ;;  %v641_v44 = vmul.f32 %v1899_v29, %v1899_v29 }
  0x44   :  { %v608_v48 = vrot.slane %v1903_v35, 7  ;;  %v642_v49 = vmul.f32 %v1903_v35, %v1903_v35  ;;  %v724_v52 = vadd.f32 %v722_v36, %v716_v24  ;;  %v732_v47 = vmul.f32 %v730_v37, %v1653_v7 }
  0x45   :  { %v733_v53 = vadd.f32 %v731_v42, %v723_v41  ;;  %v740_v54 = vstv %s1884_s23  ;;  %v717_v55 = vmul.f32 %v714_v22, %v1636_v4  ;;  %v630_v60 = vsel %vm115_vm1, %v628_v40, 0.0 }
  0x46   :  { %v645_v59 = vrot.slane %v642_v49, 7  ;;  %v741_v56 = vmul.f32 %v740_v54, %v1665_v10  ;;  %v742_v8 = vmul.f32 %v740_v54, %v1670_v11  ;;  %v609_v12 = vsel %vm112_vm0, %v608_v48, %v1899_v29 }
  0x47   :  { %v734_v63 = vadd.f32 %v732_v47, %v724_v52  ;;  %v718_v13 = vmul.f32 %v714_v22, %v1646_v6  ;;  %v725_v14 = vmul.f32 %v720_v25, %v1658_v9  ;;  %v726_v19 = vmul.f32 %v720_v25, %v1677_v15 }
  0x48   :  { %v646_v18 = vsel %vm112_vm0, %v645_v59, %v641_v44  ;;  %v1932_v23 = vadd.f32 %v741_v56, %v733_v53  ;;  %v735_v24 = vmul.f32 %v730_v37, %v1685_v20  ;;  %v736_v22 = vmul.f32 %v730_v37, %v1690_v21 }
  0x49   :  { %490 = vadd.xlane.f32.xlu0 %v489_v33  ;;  %v648_v28 = vsel %vm115_vm1, %v646_v18, 0.0  ;;  %v1937_v31 = vadd.f32 %v742_v8, %v734_v63  ;;  %v727_v32 = vadd.f32 %v725_v14, %v717_v55  ;;  %v728_v40 = vadd.f32 %v726_v19, %v718_v13 }
  0x4a   :  { %649 = vadd.xlane.f32.xlu2 %v648_v28  ;;  %v782_v36 = vmul.f32 %v1932_v23, %v1932_v23  ;;  %v745_v25 = vmul.f32 %v740_v54, %v1700_v26  ;;  %v746_v41 = vmul.f32 %v740_v54, %v1705_v27  ;;  %v873_v37 = vstv %s1910_s24 }
  0x4b   :  { %596 = vadd.xlane.f32.xlu1 %v595_v38  ;;  %v751_v33 = vrot.slane %v1937_v31, 7  ;;  %v783_v42 = vmul.f32 %v1937_v31, %v1937_v31  ;;  %v737_v48 = vadd.f32 %v735_v24, %v727_v32  ;;  %v738_v44 = vadd.f32 %v736_v22, %v728_v40 }
  0x4c   :  { %v876_v49 = vmul.f32 %v873_v37, %v1636_v4  ;;  %v877_v52 = vmul.f32 %v873_v37, %v1646_v6  ;;  %v879_v47 = vstv %s1917_s25  ;;  %v611_v53 = vsel %vm115_vm1, %v609_v12, 0.0 }
  0x4d   :  { %v786_v55 = vrot.slane %v783_v42, 7  ;;  %v1954_v59 = vadd.f32 %v745_v25, %v737_v48  ;;  %v884_v38 = vmul.f32 %v879_v47, %v1658_v9  ;;  %v752_v54 = vsel %vm112_vm0, %v751_v33, %v1932_v23 }
  0x4e   :  { %v1961_v56 = vadd.f32 %v746_v41, %v738_v44  ;;  %v885_v8 = vmul.f32 %v879_v47, %v1677_v15  ;;  %v889_v63 = vstv %s1925_s26  ;;  %v899_v40 = vstv %s1940_s27  ;;  %s1570_s26 = smov 1  }
  0x4f   :  { %v787_v12 = vsel %vm112_vm0, %v786_v55, %v782_v36  ;;  %v800_v13 = vmul.f32 %v1954_v59, %v1954_v59  ;;  %v886_v14 = vadd.f32 %v884_v38, %v876_v49  ;;  %v894_v18 = vmul.f32 %v889_v63, %v1685_v20 }
  0x50   :  { %v789_v19 = vsel %vm115_vm1, %v787_v12, 0.0  ;;  %v767_v24 = vrot.slane %v1961_v56, 7  ;;  %v801_v28 = vmul.f32 %v1961_v56, %v1961_v56  ;;  %v887_v32 = vadd.f32 %v885_v8, %v877_v52 }
  0x51   :  { %612 = vadd.xlane.f32.xlu0 %v611_v53  ;;  %v895_v22 = vmul.f32 %v889_v63, %v1690_v21  ;;  %v896_v36 = vadd.f32 %v894_v18, %v886_v14  ;;  %v874_v25 = vmul.f32 %v873_v37, %v1616_v0  ;;  %v904_v42 = vmul.f32 %v899_v40, %v1700_v26 }
  0x52   :  { %790 = vadd.xlane.f32.xlu2 %v789_v19  ;;  %v768_v41 = vsel %vm112_vm0, %v767_v24, %v1954_v59  ;;  %v804_v33 = vrot.slane %v801_v28, 7  ;;  %v905_v48 = vmul.f32 %v899_v40, %v1705_v27  ;;  %v754_v44 = vsel %vm115_vm1, %v752_v54, 0.0 }
  0x53   :  { %631 = vadd.xlane.f32.xlu1 %v630_v60  ;;  %v897_v49 = vadd.f32 %v895_v22, %v887_v32  ;;  %v875_v52 = vmul.f32 %v873_v37, %v1621_v1  ;;  %v880_v53 = vmul.f32 %v879_v47, %v1626_v2  ;;  %v770_v55 = vsel %vm115_vm1, %v768_v41, 0.0 }
  0x54   :  { %v805_v38 = vsel %vm112_vm0, %v804_v33, %v800_v13  ;;  %v881_v8 = vmul.f32 %v879_v47, %v1631_v3  ;;  %v890_v12 = vmul.f32 %v889_v63, %v1641_v5  ;;  %v1993_v60 = vadd.f32 %v904_v42, %v896_v36 }
  0x55   :  { %v1995_v14 = vadd.f32 %v905_v48, %v897_v49  ;;  %v882_v54 = vadd.f32 %v880_v53, %v874_v25  ;;  %v891_v37 = vmul.f32 %v889_v63, %v1653_v7  ;;  %v900_v19 = vmul.f32 %v899_v40, %v1665_v10 }
  0x56   :  { %v883_v18 = vadd.f32 %v881_v8, %v875_v52  ;;  %v901_v24 = vmul.f32 %v899_v40, %v1670_v11  ;;  %v1032_v13 = vstv %s1957_s28  ;;  %v1038_v41 = vstv %s1965_s29  ;;  %s2187_s29 = sld [smem:[#allocation5 + $0x2]] }
  0x57   :  { %v926_v28 = vrot.slane %v1995_v14, 7  ;;  %v892_v47 = vadd.f32 %v890_v12, %v882_v54  ;;  %v1033_v32 = vmul.f32 %v1032_v13, %v1616_v0  ;;  %v1034_v22 = vmul.f32 %v1032_v13, %v1621_v1 }
  0x58   :  { %v893_v36 = vadd.f32 %v891_v37, %v883_v18  ;;  %v1048_v33 = vstv %s1971_s1  ;;  %v1058_v42 = vstv %s1977_s6  ;;  %v1039_v40 = vmul.f32 %v1038_v41, %v1626_v2  ;;  %s2194_s6 = sld [smem:[#allocation7 + $0x2]] }
  0x59   :  { %755 = vadd.xlane.f32.xlu0 %v754_v44  ;;  %v927_v63 = vsel %vm112_vm0, %v926_v28, %v1993_v60  ;;  %v2009_v25 = vadd.f32 %v900_v19, %v892_v47  ;;  %v1040_v48 = vmul.f32 %v1038_v41, %v1631_v3  ;;  %v1049_v53 = vmul.f32 %v1048_v33, %v1641_v5 }
  0x5a   :  { %v929_v49 = vsel %vm115_vm1, %v927_v63, 0.0  ;;  %v2016_v52 = vadd.f32 %v901_v24, %v893_v36  ;;  %v1050_v8 = vmul.f32 %v1048_v33, %v1653_v7  ;;  %v807_v44 = vsel %vm115_vm1, %v805_v38, 0.0 }
  0x5b   :  { %771 = vadd.xlane.f32.xlu1 %v770_v55  ;;  %930 = vadd.xlane.f32.xlu2 %v929_v49  ;;  %v941_v12 = vmul.f32 %v2009_v25, %v2009_v25  ;;  %v1041_v54 = vadd.f32 %v1039_v40, %v1033_v32  ;;  %v1042_v37 = vadd.f32 %v1040_v48, %v1034_v22 }
  0x5c   :  { %v910_v18 = vrot.slane %v2016_v52, 7  ;;  %v942_v19 = vmul.f32 %v2016_v52, %v2016_v52  ;;  %v1059_v24 = vmul.f32 %v1058_v42, %v1665_v10  ;;  %v1060_v28 = vmul.f32 %v1058_v42, %v1670_v11 }
  0x5d   :  { %v1051_v55 = vadd.f32 %v1049_v53, %v1041_v54  ;;  %v1052_v47 = vadd.f32 %v1050_v8, %v1042_v37  ;;  %v959_v38 = vmul.f32 %v1993_v60, %v1993_v60  ;;  %v960_v32 = vmul.f32 %v1995_v14, %v1995_v14 }
  0x5e   :  { %v911_v22 = vsel %vm112_vm0, %v910_v18, %v2009_v25  ;;  %v945_v36 = vrot.slane %v942_v19, 7  ;;  %v1035_v63 = vmul.f32 %v1032_v13, %v1636_v4  ;;  %v1036_v40 = vmul.f32 %v1032_v13, %v1646_v6 }
  0x5f   :  { %v913_v48 = vsel %vm115_vm1, %v911_v22, 0.0  ;;  %v2041_v49 = vadd.f32 %v1059_v24, %v1051_v55  ;;  %v2043_v53 = vadd.f32 %v1060_v28, %v1052_v47  ;;  %v963_v8 = vrot.slane %v960_v32, 7 }
  0x60   :  { %v946_v54 = vsel %vm112_vm0, %v945_v36, %v941_v12  ;;  %v1043_v37 = vmul.f32 %v1038_v41, %v1658_v9  ;;  %v1044_v18 = vmul.f32 %v1038_v41, %v1677_v15  ;;  %v1053_v19 = vmul.f32 %v1048_v33, %v1685_v20 }
  0x61   :  { %2385 = vst [vmem:[#allocation12_spill] sm:$0xff] %v2041_v49  ;;  %808 = vadd.xlane.f32.xlu0 %v807_v44  ;;  %v948_v13 = vsel %vm115_vm1, %v946_v54, 0.0  ;;  %v1069_v22 = vrot.slane %v2043_v53, 7  ;;  %v1054_v24 = vmul.f32 %v1048_v33, %v1690_v21  ;;  %v1191_v28 = vstv %s2013_s3 }
  0x62   :  { %2386 = vst [vmem:[#allocation13_spill] sm:$0xff] %v2043_v53  ;;  %v964_v55 = vsel %vm112_vm0, %v963_v8, %v959_v38  ;;  %v1045_v47 = vadd.f32 %v1043_v37, %v1035_v63  ;;  %v1046_v12 = vadd.f32 %v1044_v18, %v1036_v40  ;;  %v1063_v32 = vmul.f32 %v1058_v42, %v1700_v26 }
  0x63   :  { %914 = vadd.xlane.f32.xlu1 %v913_v48  ;;  %v1070_v41 = vsel %vm112_vm0, %v1069_v22, %v2041_v49  ;;  %v1064_v44 = vmul.f32 %v1058_v42, %v1705_v27  ;;  %v1100_v36 = vmul.f32 %v2041_v49, %v2041_v49  ;;  %v1101_v33 = vmul.f32 %v2043_v53, %v2043_v53 }
  0x64   :  { %v1072_v38 = vsel %vm115_vm1, %v1070_v41, 0.0  ;;  %v1055_v63 = vadd.f32 %v1053_v19, %v1045_v47  ;;  %v1056_v8 = vadd.f32 %v1054_v24, %v1046_v12  ;;  %v1192_v40 = vmul.f32 %v1191_v28, %v1616_v0 }
  0x65   :  { %1073 = vadd.xlane.f32.xlu2 %v1072_v38  ;;  %v1104_v48 = vrot.slane %v1101_v33, 7  ;;  %v1193_v54 = vmul.f32 %v1191_v28, %v1621_v1  ;;  %v1197_v37 = vstv %s2028_s7  ;;  %v1207_v18 = vstv %s2034_s30 }
  0x66   :  { %v2069_v42 = vadd.f32 %v1063_v32, %v1055_v63  ;;  %v2071_v22 = vadd.f32 %v1064_v44, %v1056_v8  ;;  %v1198_v49 = vmul.f32 %v1197_v37, %v1626_v2  ;;  %v1199_v53 = vmul.f32 %v1197_v37, %v1631_v3 }
  0x67   :  { %v1208_v41 = vmul.f32 %v1207_v18, %v1641_v5  ;;  %v1209_v19 = vmul.f32 %v1207_v18, %v1653_v7  ;;  %v1217_v24 = vstv %s2045_s8  ;;  %v966_v0 = vsel %vm115_vm1, %v964_v55, 0.0  ;;  %s2209_s8 = sld [smem:[#allocation5 + $0x3]] }
  0x68   :  { %v1085_v47 = vrot.slane %v2071_v22, 7  ;;  %v1118_v1 = vmul.f32 %v2069_v42, %v2069_v42  ;;  %v1119_v12 = vmul.f32 %v2071_v22, %v2071_v22  ;;  %v1200_v32 = vadd.f32 %v1198_v49, %v1192_v40 }
  0x69   :  { %949 = vadd.xlane.f32.xlu0 %v948_v13  ;;  %v1201_v2 = vadd.f32 %v1199_v53, %v1193_v54  ;;  %v1218_v3 = vmul.f32 %v1217_v24, %v1665_v10  ;;  %v1219_v5 = vmul.f32 %v1217_v24, %v1670_v11  ;;  %v1105_v7 = vsel %vm112_vm0, %v1104_v48, %v1100_v36 }
  0x6a   :  { %v1122_v44 = vrot.slane %v1119_v12, 7  ;;  %v1194_v55 = vmul.f32 %v1191_v28, %v1636_v4  ;;  %v1195_v33 = vmul.f32 %v1191_v28, %v1646_v6  ;;  %v1086_v38 = vsel %vm112_vm0, %v1085_v47, %v2069_v42 }
  0x6b   :  { %967 = vadd.xlane.f32.xlu1 %v966_v0  ;;  %v1210_v63 = vadd.f32 %v1208_v41, %v1200_v32  ;;  %v1211_v8 = vadd.f32 %v1209_v19, %v1201_v2  ;;  %v1202_v49 = vmul.f32 %v1197_v37, %v1658_v9  ;;  %v1203_v10 = vmul.f32 %v1197_v37, %v1677_v15 }
  0x6c   :  { %v1123_v53 = vsel %vm112_vm0, %v1122_v44, %v1118_v1  ;;  %v1212_v11 = vmul.f32 %v1207_v18, %v1685_v20  ;;  %v1213_v13 = vmul.f32 %v1207_v18, %v1690_v21  ;;  %v1088_v40 = vsel %vm115_vm1, %v1086_v38, 0.0 }
  0x6d   :  { %v1125_v4 = vsel %vm115_vm1, %v1123_v53, 0.0  ;;  %v2097_v36 = vadd.f32 %v1218_v3, %v1210_v63  ;;  %v2099_v6 = vadd.f32 %v1219_v5, %v1211_v8  ;;  %v1204_v28 = vadd.f32 %v1202_v49, %v1194_v55 }
  0x6e   :  { %1126 = vadd.xlane.f32.xlu2 %v1125_v4  ;;  %v1205_v48 = vadd.f32 %v1203_v10, %v1195_v33  ;;  %v1222_v9 = vmul.f32 %v1217_v24, %v1700_v26  ;;  %v1223_v54 = vmul.f32 %v1217_v24, %v1705_v27  ;;  %v1107_v18 = vsel %vm115_vm1, %v1105_v7, 0.0 }
  0x6f   :  { %v1228_v15 = vrot.slane %v2099_v6, 7  ;;  %v1259_v20 = vmul.f32 %v2097_v36, %v2097_v36  ;;  %v1260_v21 = vmul.f32 %v2099_v6, %v2099_v6  ;;  %v1214_v37 = vadd.f32 %v1212_v11, %v1204_v28 }
  0x70   :  { %v1215_v41 = vadd.f32 %v1213_v13, %v1205_v48 }
  0x71   :  { %1089 = vadd.xlane.f32.xlu0 %v1088_v40  ;;  %v1263_v19 = vrot.slane %v1260_v21, 7  ;;  %v2110_v0 = vadd.f32 %v1222_v9, %v1214_v37  ;;  %v1229_v26 = vsel %vm112_vm0, %v1228_v15, %v2097_v36 }
  0x72   :  { %v2112_v47 = vadd.f32 %v1223_v54, %v1215_v41  ;;  %v1231_v32 = vsel %vm115_vm1, %v1229_v26, 0.0 }
  0x73   :  { %1108 = vadd.xlane.f32.xlu1 %v1107_v18  ;;  %v1264_v27 = vsel %vm112_vm0, %v1263_v19, %v1259_v20  ;;  %v1277_v3 = vmul.f32 %v2110_v0, %v2110_v0 }
  0x74   :  { %v1266_v24 = vsel %vm115_vm1, %v1264_v27, 0.0  ;;  %v1244_v1 = vrot.slane %v2112_v47, 7  ;;  %v1278_v12 = vmul.f32 %v2112_v47, %v2112_v47 }
  0x76   :  { %1267 = vadd.xlane.f32.xlu2 %v1266_v24  ;;  %v1245_v2 = vsel %vm112_vm0, %v1244_v1, %v2110_v0  ;;  %v1281_v5 = vrot.slane %v1278_v12, 7 }
  0x77   :  { %v1247_v44 = vsel %vm115_vm1, %v1245_v2, 0.0 }
  0x78   :  { %v1282_v7 = vsel %vm112_vm0, %v1281_v5, %v1277_v3 }
  0x79   :  { %1232 = vadd.xlane.f32.xlu0 %v1231_v32  ;;  %v1284_v55 = vsel %vm115_vm1, %v1282_v7, 0.0 }
  0x7b   :  { %1248 = vadd.xlane.f32.xlu1 %v1247_v44 }
  0x81   :  { %1285 = vadd.xlane.f32.xlu0 %v1284_v55 }
  0x94   :  { %v118_v33 = vpop.xlane.xlu0 %117 }
  0x95   :  { %v119_v38 = vrot.slane %v118_v33, 4 }
  0x96   :  { %v153_v63 = vpop.xlane.xlu1 %152 }
  0x97   :  { %v120_v8 = vadd.f32 %v119_v38, %v118_v33  ;;  %v154_v49 = vrot.slane %v153_v63, 4 }
  0x99   :  { %v121_v53 = vrot.slane %v120_v8, 2  ;;  %v155_v10 = vadd.f32 %v154_v49, %v153_v63 }
  0x9b   :  { %v122_v11 = vadd.f32 %v121_v53, %v120_v8  ;;  %v156_v13 = vrot.slane %v155_v10, 2 }
  0x9c   :  { %v134_v4 = vpop.xlane.xlu0 %133 }
  0x9d   :  { %v135_v28 = vrot.slane %v134_v4, 4  ;;  %v123_v40 = vrot.slane %v122_v11, 1  ;;  %v279_v48 = vpop.xlane.xlu2 %278  ;;  %v157_v18 = vadd.f32 %v156_v13, %v155_v10 }
  0x9e   :  { %v171_v9 = vpop.xlane.xlu1 %170  ;;  %v280_v54 = vrot.slane %v279_v48, 4 }
  0x9f   :  { %v136_v15 = vadd.f32 %v135_v28, %v134_v4  ;;  %v172_v20 = vrot.slane %v171_v9, 4  ;;  %v124_v21 = vadd.f32 %v123_v40, %v122_v11  ;;  %v158_v12 = vrot.slane %v157_v18, 1 }
  0xa0   :  { %v281_v37 = vadd.f32 %v280_v54, %v279_v48 }
  0xa1   :  { %v137_v41 = vrot.slane %v136_v15, 2  ;;  %v173_v19 = vadd.f32 %v172_v20, %v171_v9  ;;  %1414 = vpush %v124_v21  ;;  %v159_v8 = vadd.f32 %v158_v12, %v157_v18 }
  0xa2   :  { %v282_v26 = vrot.slane %v281_v37, 2 }
  0xa3   :  { %v174_v27 = vrot.slane %v173_v19, 2  ;;  %v138_v24 = vadd.f32 %v137_v41, %v136_v15 }
  0xa4   :  { %v295_v1 = vpop.xlane.xlu0 %294  ;;  %v283_v32 = vadd.f32 %v282_v26, %v281_v37 }
  0xa5   :  { %v296_v2 = vrot.slane %v295_v1, 4  ;;  %v139_v3 = vrot.slane %v138_v24, 1  ;;  %v175_v5 = vadd.f32 %v174_v27, %v173_v19 }
  0xa6   :  { %v314_v44 = vpop.xlane.xlu1 %313  ;;  %v284_v7 = vrot.slane %v283_v32, 1 }
  0xa7   :  { %v297_v55 = vadd.f32 %v296_v2, %v295_v1  ;;  %v315_v33 = vrot.slane %v314_v44, 4  ;;  %v140_v38 = vadd.f32 %v139_v3, %v138_v24  ;;  %v176_v63 = vrot.slane %v175_v5, 1 }
  0xa8   :  { %v285_v49 = vadd.f32 %v284_v7, %v283_v32 }
  0xa9   :  { %v298_v53 = vrot.slane %v297_v55, 2  ;;  %v316_v10 = vadd.f32 %v315_v33, %v314_v44  ;;  %1416 = vpush %v140_v38  ;;  %v177_v11 = vadd.f32 %v176_v63, %v175_v5 }
  0xaa   :  { %1418 = vpush %v159_v8 }
  0xab   :  { %v317_v13 = vrot.slane %v316_v10, 2  ;;  %1420 = vpush %v177_v11  ;;  %v299_v4 = vadd.f32 %v298_v53, %v297_v55 }
  0xac   :  { %v332_v28 = vpop.xlane.xlu0 %331  ;;  %1422 = vpush %v285_v49 }
  0xad   :  { %v333_v40 = vrot.slane %v332_v28, 4  ;;  %v300_v48 = vrot.slane %v299_v4, 1  ;;  %v318_v9 = vadd.f32 %v317_v13, %v316_v10 }
  0xae   :  { %v438_v54 = vpop.xlane.xlu1 %437 }
  0xaf   :  { %v334_v15 = vadd.f32 %v333_v40, %v332_v28  ;;  %v439_v20 = vrot.slane %v438_v54, 4  ;;  %v301_v21 = vadd.f32 %v300_v48, %v299_v4  ;;  %v319_v37 = vrot.slane %v318_v9, 1 }
  0xb1   :  { %v335_v18 = vrot.slane %v334_v15, 2  ;;  %v440_v41 = vadd.f32 %v439_v20, %v438_v54  ;;  %1424 = vpush %v301_v21  ;;  %v320_v19 = vadd.f32 %v319_v37, %v318_v9 }
  0xb3   :  { %v441_v26 = vrot.slane %v440_v41, 2  ;;  %1426 = vpush %v320_v19  ;;  %v336_v27 = vadd.f32 %v335_v18, %v334_v15 }
  0xb4   :  { %v454_v24 = vpop.xlane.xlu0 %453 }
  0xb5   :  { %v455_v1 = vrot.slane %v454_v24, 4  ;;  %v337_v12 = vrot.slane %v336_v27, 1  ;;  %v442_v32 = vadd.f32 %v441_v26, %v440_v41 }
  0xb6   :  { %v473_v2 = vpop.xlane.xlu1 %472 }
  0xb7   :  { %v456_v3 = vadd.f32 %v455_v1, %v454_v24  ;;  %v474_v5 = vrot.slane %v473_v2, 4  ;;  %v338_v44 = vadd.f32 %v337_v12, %v336_v27  ;;  %v443_v7 = vrot.slane %v442_v32, 1 }
  0xb9   :  { %v457_v55 = vrot.slane %v456_v3, 2  ;;  %v475_v33 = vadd.f32 %v474_v5, %v473_v2  ;;  %1428 = vpush %v338_v44  ;;  %v444_v38 = vadd.f32 %v443_v7, %v442_v32 }
  0xbb   :  { %v476_v63 = vrot.slane %v475_v33, 2  ;;  %1430 = vpush %v444_v38  ;;  %v458_v8 = vadd.f32 %v457_v55, %v456_v3 }
  0xbc   :  { %v491_v49 = vpop.xlane.xlu0 %490 }
  0xbd   :  { %v492_v53 = vrot.slane %v491_v49, 4  ;;  %v459_v10 = vrot.slane %v458_v8, 1  ;;  %v477_v11 = vadd.f32 %v476_v63, %v475_v33  ;;  %v650_v13 = vpop.xlane.xlu2 %649 }
  0xbe   :  { %v597_v4 = vpop.xlane.xlu1 %596  ;;  %v651_v28 = vrot.slane %v650_v13, 4 }
  0xbf   :  { %v493_v40 = vadd.f32 %v492_v53, %v491_v49  ;;  %v598_v48 = vrot.slane %v597_v4, 4  ;;  %v460_v9 = vadd.f32 %v459_v10, %v458_v8  ;;  %v478_v54 = vrot.slane %v477_v11, 1 }
  0xc0   :  { %v652_v15 = vadd.f32 %v651_v28, %v650_v13 }
  0xc1   :  { %v494_v20 = vrot.slane %v493_v40, 2  ;;  %v599_v21 = vadd.f32 %v598_v48, %v597_v4  ;;  %1432 = vpush %v460_v9  ;;  %v479_v37 = vadd.f32 %v478_v54, %v477_v11 }
  0xc2   :  { %v653_v26 = vrot.slane %v652_v15, 2 }
  0xc3   :  { %v600_v18 = vrot.slane %v599_v21, 2  ;;  %1434 = vpush %v479_v37  ;;  %v495_v41 = vadd.f32 %v494_v20, %v493_v40 }
  0xc4   :  { %v613_v19 = vpop.xlane.xlu0 %612  ;;  %v654_v33 = vadd.f32 %v653_v26, %v652_v15 }
  0xc5   :  { %v614_v27 = vrot.slane %v613_v19, 4  ;;  %v496_v24 = vrot.slane %v495_v41, 1  ;;  %v601_v1 = vadd.f32 %v600_v18, %v599_v21  ;;  %v791_v12 = vpop.xlane.xlu2 %790 }
  0xc6   :  { %v632_v32 = vpop.xlane.xlu1 %631  ;;  %v792_v2 = vrot.slane %v791_v12, 4  ;;  %v655_v13 = vrot.slane %v654_v33, 1 }
  0xc7   :  { %v615_v3 = vadd.f32 %v614_v27, %v613_v19  ;;  %v633_v5 = vrot.slane %v632_v32, 4  ;;  %v497_v44 = vadd.f32 %v496_v24, %v495_v41  ;;  %v602_v7 = vrot.slane %v601_v1, 1 }
  0xc8   :  { %v793_v55 = vadd.f32 %v792_v2, %v791_v12  ;;  %v656_v15 = vadd.f32 %v655_v13, %v654_v33 }
  0xc9   :  { %v616_v38 = vrot.slane %v615_v3, 2  ;;  %v634_v63 = vadd.f32 %v633_v5, %v632_v32  ;;  %1436 = vpush %v497_v44  ;;  %v603_v8 = vadd.f32 %v602_v7, %v601_v1 }
  0xca   :  { %v794_v11 = vrot.slane %v793_v55, 2 }
  0xcb   :  { %v635_v49 = vrot.slane %v634_v63, 2  ;;  %1438 = vpush %v603_v8  ;;  %v617_v53 = vadd.f32 %v616_v38, %v615_v3 }
  0xcc   :  { %v756_v10 = vpop.xlane.xlu0 %755  ;;  %v795_v41 = vadd.f32 %v794_v11, %v793_v55 }
  0xcd   :  { %v757_v4 = vrot.slane %v756_v10, 4  ;;  %v618_v28 = vrot.slane %v617_v53, 1  ;;  %v636_v40 = vadd.f32 %v635_v49, %v634_v63 }
  0xce   :  { %v772_v48 = vpop.xlane.xlu1 %771  ;;  %v931_v9 = vpop.xlane.xlu2 %930  ;;  %v796_v3 = vrot.slane %v795_v41, 1 }
  0xcf   :  { %v758_v54 = vadd.f32 %v757_v4, %v756_v10  ;;  %v773_v20 = vrot.slane %v772_v48, 4  ;;  %v619_v21 = vadd.f32 %v618_v28, %v617_v53  ;;  %v637_v37 = vrot.slane %v636_v40, 1 }
  0xd0   :  { %v932_v18 = vrot.slane %v931_v9, 4  ;;  %v797_v49 = vadd.f32 %v796_v3, %v795_v41 }
  0xd1   :  { %v759_v19 = vrot.slane %v758_v54, 2  ;;  %v774_v26 = vadd.f32 %v773_v20, %v772_v48  ;;  %1440 = vpush %v619_v21  ;;  %v638_v27 = vadd.f32 %v637_v37, %v636_v40 }
  0xd2   :  { %v933_v24 = vadd.f32 %v932_v18, %v931_v9  ;;  %s1415_s9 = spop %1414 }
  0xd3   :  { %v775_v1 = vrot.slane %v774_v26, 2  ;;  %1442 = vpush %v638_v27  ;;  %v760_v12 = vadd.f32 %v759_v19, %v758_v54  ;;  %v126_v40 = vstv %s1415_s9 }
  0xd4   :  { %1444 = vpush %v656_v15  ;;  %v809_v32 = vpop.xlane.xlu0 %808  ;;  %v934_v2 = vrot.slane %v933_v24, 2 }
  0xd5   :  { %v810_v5 = vrot.slane %v809_v32, 4  ;;  %v761_v44 = vrot.slane %v760_v12, 1  ;;  %v776_v7 = vadd.f32 %v775_v1, %v774_v26 }
  0xd6   :  { %v915_v38 = vpop.xlane.xlu1 %914  ;;  %v935_v10 = vadd.f32 %v934_v2, %v933_v24 }
  0xd7   :  { %v811_v63 = vadd.f32 %v810_v5, %v809_v32  ;;  %v916_v33 = vrot.slane %v915_v38, 4  ;;  %v762_v8 = vadd.f32 %v761_v44, %v760_v12  ;;  %v777_v55 = vrot.slane %v776_v7, 1 }
  0xd8   :  { %v1074_v53 = vpop.xlane.xlu2 %1073  ;;  %v936_v18 = vrot.slane %v935_v10, 1 }
  0xd9   :  { %v812_v11 = vrot.slane %v811_v63, 2  ;;  %v917_v13 = vadd.f32 %v916_v33, %v915_v38  ;;  %1446 = vpush %v762_v8  ;;  %v778_v4 = vadd.f32 %v777_v55, %v776_v7  ;;  %v1075_v28 = vrot.slane %v1074_v53, 4 }
  0xda   :  { %s1417_s0 = spop %1416 }
  0xdb   :  { %v918_v48 = vrot.slane %v917_v13, 2  ;;  %v142_v9 = vstv %s1417_s0  ;;  %s1419_s10 = spop %1418  ;;  %1448 = vpush %v778_v4  ;;  %v813_v54 = vadd.f32 %v812_v11, %v811_v63  ;;  %v1076_v15 = vadd.f32 %v1075_v28, %v1074_v53 }
  0xdc   :  { %v143_v20 = vadd.f32 %v142_v9, %v126_v40  ;;  %v161_v21 = vstv %s1419_s10  ;;  %1450 = vpush %v797_v49  ;;  %s1421_s11 = spop %1420  ;;  %v950_v37 = vpop.xlane.xlu0 %949  ;;  %v937_v63 = vadd.f32 %v936_v18, %v935_v10  ;;  %s2220_s10 = sld [smem:[#allocation7 + $0x3]] }
  0xdd   :  { %v179_v41 = vstv %s1421_s11  ;;  %v951_v19 = vrot.slane %v950_v37, 4  ;;  %v814_v26 = vrot.slane %v813_v54, 1  ;;  %v919_v27 = vadd.f32 %v918_v48, %v917_v13  ;;  %s1423_s12 = spop %1422 }
  0xde   :  { %v2129_v24 = vmul.f32 0.03125, %v143_v20  ;;  %v180_v1 = vadd.f32 %v179_v41, %v161_v21  ;;  %v1077_v12 = vrot.slane %v1076_v15, 2  ;;  %v968_v32 = vpop.xlane.xlu1 %967  ;;  %v287_v28 = vstv %s1423_s12 }
  0xdf   :  { %v952_v2 = vadd.f32 %v951_v19, %v950_v37  ;;  %v969_v3 = vrot.slane %v968_v32, 4  ;;  %v815_v5 = vadd.f32 %v814_v26, %v813_v54  ;;  %v920_v44 = vrot.slane %v919_v27, 1 }
  0xe0   :  { %v183_v7 = vmul.f32 %v2129_v24, %v2129_v24  ;;  %v182_v38 = vmul.f32 0.03125, %v180_v1  ;;  %v1078_v53 = vadd.f32 %v1077_v12, %v1076_v15 }
  0xe1   :  { %v953_v33 = vrot.slane %v952_v2, 2  ;;  %v970_v8 = vadd.f32 %v969_v3, %v968_v32  ;;  %1452 = vpush %v815_v5  ;;  %v921_v55 = vadd.f32 %v920_v44, %v919_v27  ;;  %v1127_v49 = vpop.xlane.xlu2 %1126 }
  0xe2   :  { %v184_v11 = vsub.f32 %v182_v38, %v183_v7  ;;  %s1425_s2 = spop %1424  ;;  %v1128_v13 = vrot.slane %v1127_v49, 4  ;;  %v1079_v18 = vrot.slane %v1078_v53, 1 }
  0xe3   :  { %v971_v4 = vrot.slane %v970_v8, 2  ;;  %v303_v40 = vstv %s1425_s2  ;;  %1454 = vpush %v921_v55  ;;  %v954_v48 = vadd.f32 %v953_v33, %v952_v2  ;;  %s2230_s2 = sld [smem:[#allocation5 + $0x4]] }
  0xe4   :  { %v185_v9 = vmax.f32 %v184_v11, 0.0  ;;  %1456 = vpush %v937_v63  ;;  %v1090_v54 = vpop.xlane.xlu0 %1089  ;;  %v1129_v20 = vadd.f32 %v1128_v13, %v1127_v49  ;;  %v304_v19 = vadd.f32 %v303_v40, %v287_v28  ;;  %s1427_s4 = spop %1426  ;;  %v1080_v5 = vadd.f32 %v1079_v18, %v1078_v53 }
  0xe5   :  { %v1091_v21 = vrot.slane %v1090_v54, 4  ;;  %v955_v10 = vrot.slane %v954_v48, 1  ;;  %v972_v37 = vadd.f32 %v971_v4, %v970_v8  ;;  %v322_v8 = vstv %s1427_s4 }
  0xe6   :  { %v2133_v41 = vadd.f32 1e-05, %v185_v9  ;;  %v1130_v15 = vrot.slane %v1129_v20, 2  ;;  %v1109_v26 = vpop.xlane.xlu1 %1108  ;;  %v2136_v38 = vmul.f32 0.03125, %v304_v19 }
  0xe7   :  { %v1092_v27 = vadd.f32 %v1091_v21, %v1090_v54  ;;  %v1110_v1 = vrot.slane %v1109_v26, 4  ;;  %v956_v12 = vadd.f32 %v955_v10, %v954_v48  ;;  %v973_v32 = vrot.slane %v972_v37, 1 }
  0xe8   :  { %1485 = vrsqrt.f32 %v2133_v41  ;;  %v1131_v7 = vadd.f32 %v1130_v15, %v1129_v20  ;;  %v344_v20 = vmul.f32 %v2136_v38, %v2136_v38  ;;  %vm194_vm3 = vweird.f32 %v2133_v41 }
  0xe9   :  { %v1093_v2 = vrot.slane %v1092_v27, 2  ;;  %v1111_v3 = vadd.f32 %v1110_v1, %v1109_v26  ;;  %1458 = vpush %v956_v12  ;;  %v1268_v44 = vpop.xlane.xlu2 %1267  ;;  %v974_v63 = vadd.f32 %v973_v32, %v972_v37 }
  0xea   :  { %s1429_s13 = spop %1428  ;;  %v1269_v33 = vrot.slane %v1268_v44, 4  ;;  %v1132_v53 = vrot.slane %v1131_v7, 1 }
  0xeb   :  { %v1112_v55 = vrot.slane %v1111_v3, 2  ;;  %v340_v49 = vstv %s1429_s13  ;;  %v1094_v11 = vadd.f32 %v1093_v2, %v1092_v27  ;;  %1460 = vpush %v974_v63 }
  0xec   :  { %v341_v13 = vadd.f32 %v340_v49, %v322_v8  ;;  %v1233_v4 = vpop.xlane.xlu0 %1232  ;;  %v1270_v28 = vadd.f32 %v1269_v33, %v1268_v44  ;;  %1462 = vpush %v1080_v5  ;;  %s1431_s15 = spop %1430  ;;  %v1133_v5 = vadd.f32 %v1132_v53, %v1131_v7 }
  0xed   :  { %v1234_v40 = vrot.slane %v1233_v4, 4  ;;  %v1095_v48 = vrot.slane %v1094_v11, 1  ;;  %v1113_v9 = vadd.f32 %v1112_v55, %v1111_v3 }
  0xee   :  { %v1486_v54 = vpop.eup %1485  ;;  %v343_v21 = vmul.f32 0.03125, %v341_v13  ;;  %v1271_v10 = vrot.slane %v1270_v28, 2  ;;  %v1249_v37 = vpop.xlane.xlu1 %1248  ;;  %v446_v13 = vstv %s1431_s15 }
  0xef   :  { %v189_v18 = vmul.f32 %v1486_v54, %v2133_v41  ;;  %v1235_v19 = vadd.f32 %v1234_v40, %v1233_v4  ;;  %v1250_v15 = vrot.slane %v1249_v37, 4  ;;  %v1096_v27 = vadd.f32 %v1095_v48, %v1094_v11 }
  0xf0   :  { %v345_v26 = vsub.f32 %v343_v21, %v344_v20  ;;  %v1114_v1 = vrot.slane %v1113_v9, 1  ;;  %v1272_v12 = vadd.f32 %v1271_v10, %v1270_v28  ;;  %vm195_vm2 = vweird.f32 %v1486_v54 }
  0xf1   :  { %v190_v32 = vmul.f32 %v1486_v54, %v189_v18  ;;  %v1236_v2 = vrot.slane %v1235_v19, 2  ;;  %v1251_v3 = vadd.f32 %v1250_v15, %v1249_v37  ;;  %1464 = vpush %v1096_v27  ;;  %vm196_vm4 = vmor %vm194_vm3, %vm195_vm2 }
  0xf2   :  { %v346_v44 = vmax.f32 %v345_v26, 0.0  ;;  %s1433_s16 = spop %1432  ;;  %v1115_v63 = vadd.f32 %v1114_v1, %v1113_v9  ;;  %v1273_v28 = vrot.slane %v1272_v12, 1  ;;  %v198_v9 = vstv %s2138_s14  ;;  %s2247_s14 = sld [smem:[#allocation7 + $0x4]] }
  0xf3   :  { %v191_v33 = vmul.f32 0.5, %v190_v32  ;;  %v1252_v8 = vrot.slane %v1251_v3, 2  ;;  %v462_v55 = vstv %s1433_s16  ;;  %v1237_v49 = vadd.f32 %v1236_v2, %v1235_v19 }
  0xf4   :  { %v2145_v11 = vadd.f32 1e-05, %v346_v44  ;;  %1466 = vpush %v1115_v63  ;;  %v1286_v4 = vpop.xlane.xlu0 %1285  ;;  %v463_v7 = vadd.f32 %v462_v55, %v446_v13  ;;  %s1435_s18 = spop %1434  ;;  %v1274_v27 = vadd.f32 %v1273_v28, %v1272_v12 }
  0xf5   :  { %v192_v40 = vsub.f32 1.5, %v191_v33  ;;  %1468 = vpush %v1133_v5  ;;  %v1287_v48 = vrot.slane %v1286_v4, 4  ;;  %v1238_v53 = vrot.slane %v1237_v49, 1  ;;  %v1253_v20 = vadd.f32 %v1252_v8, %v1251_v3 }
  0xf6   :  { %1487 = vrsqrt.f32 %v2145_v11  ;;  %v2153_v15 = vmul.f32 0.03125, %v463_v7  ;;  %v481_v2 = vstv %s1435_s18  ;;  %v202_v5 = vstv %s2143_s17  ;;  %s2256_s17 = sld [smem:[#allocation5 + $0x5]] }
  0xf7   :  { %v193_v21 = vmul.f32 %v1486_v54, %v192_v40  ;;  %v1288_v10 = vadd.f32 %v1287_v48, %v1286_v4  ;;  %v1239_v37 = vadd.f32 %v1238_v53, %v1237_v49  ;;  %v1254_v18 = vrot.slane %v1253_v20, 1 }
  0xf8   :  { %v503_v8 = vmul.f32 %v2153_v15, %v2153_v15  ;;  %vm355_vm6 = vweird.f32 %v2145_v11 }
  0xf9   :  { %v197_v19 = vsel %vm196_vm4, %v1486_v54, %v193_v21  ;;  %v1289_v26 = vrot.slane %v1288_v10, 2  ;;  %1470 = vpush %v1239_v37  ;;  %v1255_v32 = vadd.f32 %v1254_v18, %v1253_v20 }
  0xfa   :  { %v199_v1 = vmul.f32 %v198_v9, %v197_v19  ;;  %s1437_s20 = spop %1436 }
  0xfb   :  { %v499_v41 = vstv %s1437_s20  ;;  %v1290_v3 = vadd.f32 %v1289_v26, %v1288_v10  ;;  %1472 = vpush %v1255_v32  ;;  %v359_v10 = vstv %s2151_s19  ;;  %s2272_s20 = sld [smem:[#allocation7 + $0x5]] }
  0xfc   :  { %v1488_v44 = vpop.eup %1487  ;;  %v500_v63 = vadd.f32 %v499_v41, %v481_v2  ;;  %v201_v33 = vmul.f32 %v199_v1, %v2129_v24  ;;  %1474 = vpush %v1274_v27  ;;  %v210_v12 = vmul.f32 %v199_v1, %v1725_v50  ;;  %v211_v4 = vmul.f32 %v199_v1, %v1735_v57  ;;  %s1439_s21 = spop %1438 }
  0xfd   :  { %v350_v54 = vmul.f32 %v1488_v44, %v2145_v11  ;;  %v1291_v55 = vrot.slane %v1290_v3, 1  ;;  %v204_v28 = vmul.f32 %v199_v1, %v1719_v45  ;;  %v205_v24 = vmul.f32 %v199_v1, %v1721_v46 }
  0xfe   :  { %v502_v49 = vmul.f32 0.03125, %v500_v63  ;;  %v203_v13 = vsub.f32 %v202_v5, %v201_v33  ;;  %vm356_vm5 = vweird.f32 %v1488_v44  ;;  %v605_v57 = vstv %s1439_s21  ;;  %s2282_s21 = sld [smem:[#allocation5 + $0x6]] }
  0xff   :  { %v351_v40 = vmul.f32 %v1488_v44, %v350_v54  ;;  %v1292_v7 = vadd.f32 %v1291_v55, %v1290_v3  ;;  %vm357_vm7 = vmor %vm355_vm6, %vm356_vm5 }
 0x100   :  { %v504_v48 = vsub.f32 %v502_v49, %v503_v8  ;;  %v212_v53 = vadd.f32 %v210_v12, %v203_v13  ;;  %v213_v9 = vadd.f32 %v211_v4, %v203_v13  ;;  %v206_v20 = vadd.f32 %v204_v28, %v203_v13 }
 0x101   :  { %v352_v21 = vmul.f32 0.5, %v351_v40  ;;  %1476 = vpush %v1292_v7  ;;  %v207_v50 = vadd.f32 %v205_v24, %v203_v13  ;;  %v363_v4 = vstv %s2165_s22  ;;  %s2294_s22 = sld [smem:[#allocation7 + $0x6]] }
 0x102   :  { %v505_v37 = vmax.f32 %v504_v48, 0.0  ;;  %s1441_s23 = spop %1440  ;;  %v214_v45 = vmax.f32 %v212_v53, 0.0  ;;  %v215_v18 = vmax.f32 %v213_v9, 0.0  ;;  %v208_v27 = vmax.f32 %v206_v20, 0.0 }
 0x103   :  { %v353_v19 = vsub.f32 1.5, %v352_v21  ;;  %v621_v26 = vstv %s1441_s23  ;;  %v209_v46 = vmax.f32 %v207_v50, 0.0  ;;  %s2302_s23 = sld [smem:[#allocation5 + $0x7]] }
 0x104   :  { %v2168_v1 = vadd.f32 1e-05, %v505_v37  ;;  %v622_v32 = vadd.f32 %v621_v26, %v605_v57  ;;  %s1443_s24 = spop %1442  ;;  %v218_v2 = vrot.slane %v215_v18, 7  ;;  %v2170_v5 = vmax.f32 %v208_v27, %v214_v45 }
 0x105   :  { %v354_v41 = vmul.f32 %v1488_v44, %v353_v19  ;;  %v640_v3 = vstv %s1443_s24  ;;  %s1445_s25 = spop %1444  ;;  %v2172_v63 = vmax.f32 %v209_v46, %v215_v18  ;;  %s1413_s24 = sld [smem:[#allocation7 + $0x7]] }
 0x106   :  { %1489 = vrsqrt.f32 %v2168_v1  ;;  %v2176_v33 = vmul.f32 0.03125, %v622_v32  ;;  %v658_v11 = vstv %s1445_s25  ;;  %v219_v55 = vsel %vm112_vm0, %v218_v2, %v214_v45  ;;  %s1571_s25 = smov [#allocation8]  }
 0x107   :  { %v358_v54 = vsel %vm357_vm7, %v1488_v44, %v354_v41  ;;  %v659_v8 = vadd.f32 %v658_v11, %v640_v3  ;;  %220 = vrot.lane.b32.xlu2 %v219_v55, %s1570_s26  ;;  %vm514_vm9 = vweird.f32 %v2168_v1 }
 0x108   :  { %v360_v12 = vmul.f32 %v359_v10, %v358_v54  ;;  %v662_v49 = vmul.f32 %v2176_v33, %v2176_v33 }
 0x109   :  { %v661_v13 = vmul.f32 0.03125, %v659_v8 }
 0x10a   :  { %s1447_s27 = spop %1446  ;;  %v362_v28 = vmul.f32 %v360_v12, %v2136_v38  ;;  %v371_v44 = vmul.f32 %v360_v12, %v1790_v61  ;;  %v372_v48 = vmul.f32 %v360_v12, %v1792_v62  ;;  %v365_v53 = vmul.f32 %v360_v12, %v1761_v30 }
 0x10b   :  { %v663_v40 = vsub.f32 %v661_v13, %v662_v49  ;;  %v764_v21 = vstv %s1447_s27  ;;  %v366_v57 = vmul.f32 %v360_v12, %v1766_v34  ;;  %v518_v49 = vstv %s2187_s29  ;;  %s1355_s29 = sshll.u32 %s2382_s5, 4  ;;  %s1356_s29 = int_to_ptr.hbm [resolvable:$true] %s1355_s29 }
 0x10c   :  { %v1490_v7 = vpop.eup %1489  ;;  %s1449_s28 = spop %1448  ;;  %v364_v24 = vsub.f32 %v363_v4, %v362_v28 }
 0x10d   :  { %v509_v9 = vmul.f32 %v1490_v7, %v2168_v1  ;;  %v664_v20 = vmax.f32 %v663_v40, 0.0  ;;  %v780_v10 = vstv %s1449_s28  ;;  %s1451_s1 = spop %1450  ;;  %vm515_vm8 = vweird.f32 %v1490_v7 }
 0x10e   :  { %v781_v50 = vadd.f32 %v780_v10, %v764_v21  ;;  %v373_v37 = vadd.f32 %v371_v44, %v364_v24  ;;  %v374_v38 = vadd.f32 %v372_v48, %v364_v24  ;;  %v367_v61 = vadd.f32 %v365_v53, %v364_v24  ;;  %vm516_vm10 = vmor %vm514_vm9, %vm515_vm8 }
 0x10f   :  { %v510_v45 = vmul.f32 %v1490_v7, %v509_v9  ;;  %v2191_v18 = vadd.f32 1e-05, %v664_v20  ;;  %v368_v30 = vadd.f32 %v366_v57, %v364_v24  ;;  %v799_v41 = vstv %s1451_s1  ;;  %s1572_s1 = smov 128  }
 0x110   :  { %v375_v62 = vmax.f32 %v373_v37, 0.0  ;;  %v376_v19 = vmax.f32 %v374_v38, 0.0  ;;  %v369_v27 = vmax.f32 %v367_v61, 0.0  ;;  %v2196_v46 = vmul.f32 0.03125, %v781_v50 }
 0x111   :  { %v511_v26 = vmul.f32 0.5, %v510_v45  ;;  %1491 = vrsqrt.f32 %v2191_v18  ;;  %v370_v32 = vmax.f32 %v368_v30, 0.0  ;;  %v522_v20 = vstv %s2194_s6  ;;  %s1573_s6 = smov 8  }
 0x112   :  { %s1453_s3 = spop %1452  ;;  %v379_v34 = vrot.slane %v376_v19, 7  ;;  %v2198_v11 = vmax.f32 %v369_v27, %v375_v62  ;;  %v821_v4 = vmul.f32 %v2196_v46, %v2196_v46  ;;  %v677_v27 = vstv %s2209_s8 }
 0x113   :  { %v512_v2 = vsub.f32 1.5, %v511_v26  ;;  %v817_v3 = vstv %s1453_s3  ;;  %v2201_v55 = vmax.f32 %v370_v32, %v376_v19  ;;  %vm673_vm12 = vweird.f32 %v2191_v18 }
 0x114   :  { %v818_v54 = vadd.f32 %v817_v3, %v799_v41  ;;  %s1455_s7 = spop %1454  ;;  %v380_v8 = vsel %vm112_vm0, %v379_v34, %v375_v62 }
 0x115   :  { %v513_v12 = vmul.f32 %v1490_v7, %v512_v2  ;;  %v923_v13 = vstv %s1455_s7  ;;  %s1457_s30 = spop %1456  ;;  %381 = vrot.lane.b32.xlu1 %v380_v8, %s1570_s26 }
 0x116   :  { %v820_v28 = vmul.f32 0.03125, %v818_v54  ;;  %v939_v40 = vstv %s1457_s30 }
 0x117   :  { %v1492_v24 = vpop.eup %1491  ;;  %v517_v44 = vsel %vm516_vm10, %v1490_v7, %v513_v12  ;;  %v940_v9 = vadd.f32 %v939_v40, %v923_v13 }
 0x118   :  { %v519_v48 = vmul.f32 %v518_v49, %v517_v44  ;;  %v668_v1 = vmul.f32 %v1492_v24, %v2191_v18  ;;  %v822_v53 = vsub.f32 %v820_v28, %v821_v4  ;;  %vm674_vm11 = vweird.f32 %v1492_v24 }
 0x119   :  { %v2216_v57 = vmul.f32 0.03125, %v940_v9  ;;  %vm675_vm13 = vmor %vm673_vm12, %vm674_vm11  ;;  %vm223_vm11 = vcmask 7168   ;;  %vm233_vm12 = vcmask 57344  }
 0x11a   :  { %v669_v21 = vmul.f32 %v1492_v24, %v668_v1  ;;  %v823_v10 = vmax.f32 %v822_v53, 0.0  ;;  %s1459_s9 = spop %1458  ;;  %v521_v50 = vmul.f32 %v519_v48, %v2153_v15  ;;  %v530_v61 = vmul.f32 %v519_v48, %v1845_v16 }
 0x11b   :  { %v958_v45 = vstv %s1459_s9  ;;  %v531_v62 = vmul.f32 %v519_v48, %v1847_v17  ;;  %v524_v19 = vmul.f32 %v519_v48, %v1820_v39  ;;  %v525_v26 = vmul.f32 %v519_v48, %v1825_v43 }
 0x11c   :  { %v670_v37 = vmul.f32 0.5, %v669_v21  ;;  %v2214_v38 = vadd.f32 1e-05, %v823_v10  ;;  %v523_v7 = vsub.f32 %v522_v20, %v521_v50  ;;  %s1461_s0 = spop %1460  ;;  %v980_v39 = vmul.f32 %v2216_v57, %v2216_v57 }
 0x11d   :  { %v976_v15 = vstv %s1461_s0  ;;  %s1463_s11 = spop %1462  ;;  %v681_v20 = vstv %s2220_s10 }
 0x11e   :  { %v671_v30 = vsub.f32 1.5, %v670_v37  ;;  %1493 = vrsqrt.f32 %v2214_v38  ;;  %v977_v34 = vadd.f32 %v976_v15, %v958_v45  ;;  %v532_v32 = vadd.f32 %v530_v61, %v523_v7 }
 0x11f   :  { %v533_v2 = vadd.f32 %v531_v62, %v523_v7  ;;  %v526_v16 = vadd.f32 %v524_v19, %v523_v7  ;;  %v527_v3 = vadd.f32 %v525_v26, %v523_v7  ;;  %v1082_v40 = vstv %s1463_s11 }
 0x120   :  { %v672_v41 = vmul.f32 %v1492_v24, %v671_v30  ;;  %v979_v17 = vmul.f32 0.03125, %v977_v34  ;;  %v534_v54 = vmax.f32 %v532_v32, 0.0  ;;  %vm832_vm15 = vweird.f32 %v2214_v38 }
 0x121   :  { %v535_v8 = vmax.f32 %v533_v2, 0.0  ;;  %v528_v43 = vmax.f32 %v526_v16, 0.0  ;;  %v529_v49 = vmax.f32 %v527_v3, 0.0 }
 0x122   :  { %v676_v12 = vsel %vm675_vm13, %v1492_v24, %v672_v41  ;;  %v981_v4 = vsub.f32 %v979_v17, %v980_v39  ;;  %s1465_s12 = spop %1464 }
 0x123   :  { %v678_v13 = vmul.f32 %v677_v27, %v676_v12  ;;  %v538_v28 = vrot.slane %v535_v8, 7  ;;  %v1098_v44 = vstv %s1465_s12  ;;  %v2232_v48 = vmax.f32 %v528_v43, %v534_v54 }
 0x124   :  { %v1494_v18 = vpop.eup %1493  ;;  %v2234_v1 = vmax.f32 %v529_v49, %v535_v8  ;;  %v982_v9 = vmax.f32 %v981_v4, 0.0  ;;  %v1099_v24 = vadd.f32 %v1098_v44, %v1082_v40 }
 0x125   :  { %v827_v53 = vmul.f32 %v1494_v18, %v2214_v38  ;;  %s1467_s4 = spop %1466  ;;  %v539_v10 = vsel %vm112_vm0, %v538_v28, %v534_v54  ;;  %v680_v50 = vmul.f32 %v678_v13, %v2176_v33  ;;  %v689_v30 = vmul.f32 %v678_v13, %v1899_v29 }
 0x126   :  { %v1117_v21 = vstv %s1467_s4  ;;  %s1469_s13 = spop %1468  ;;  %v2240_v7 = vadd.f32 1e-05, %v982_v9  ;;  %v2242_v45 = vmul.f32 0.03125, %v1099_v24  ;;  %540 = vrot.lane.b32.xlu2 %v539_v10, %s1570_s26  ;;  %v690_v15 = vmul.f32 %v678_v13, %v1903_v35 }
 0x127   :  { %v828_v37 = vmul.f32 %v1494_v18, %v827_v53  ;;  %v1135_v61 = vstv %s1469_s13  ;;  %v682_v19 = vsub.f32 %v681_v20, %v680_v50  ;;  %v683_v27 = vmul.f32 %v678_v13, %v1876_v51 }
 0x128   :  { %v1136_v62 = vadd.f32 %v1135_v61, %v1117_v21  ;;  %1495 = vrsqrt.f32 %v2240_v7  ;;  %v1139_v33 = vmul.f32 %v2242_v45, %v2242_v45  ;;  %vm833_vm14 = vweird.f32 %v1494_v18 }
 0x129   :  { %v829_v26 = vmul.f32 0.5, %v828_v37  ;;  %v691_v32 = vadd.f32 %v689_v30, %v682_v19  ;;  %v692_v2 = vadd.f32 %v690_v15, %v682_v19  ;;  %v684_v29 = vmul.f32 %v678_v13, %v1881_v58  ;;  %vm834_vm1 = vmor %vm832_vm15, %vm833_vm14 }
 0x12a   :  { %v1138_v34 = vmul.f32 0.03125, %v1136_v62  ;;  %s1471_s15 = spop %1470  ;;  %v685_v16 = vadd.f32 %v683_v27, %v682_v19  ;;  %v836_v35 = vstv %s2230_s2  ;;  %v840_v53 = vstv %s2247_s14 }
 0x12b   :  { %v830_v41 = vsub.f32 1.5, %v829_v26  ;;  %v694_v39 = vmax.f32 %v692_v2, 0.0  ;;  %v693_v54 = vmax.f32 %v691_v32, 0.0  ;;  %v686_v8 = vadd.f32 %v684_v29, %v682_v19 }
 0x12c   :  { %v1140_v3 = vsub.f32 %v1138_v34, %v1139_v33  ;;  %s1473_s16 = spop %1472  ;;  %v687_v51 = vmax.f32 %v685_v16, 0.0  ;;  %v1241_v43 = vstv %s1471_s15  ;;  %vm991_vm3 = vweird.f32 %v2240_v7 }
 0x12d   :  { %v831_v17 = vmul.f32 %v1494_v18, %v830_v41  ;;  %v1257_v49 = vstv %s1473_s16  ;;  %v697_v4 = vrot.slane %v694_v39, 7  ;;  %s1475_s18 = spop %1474  ;;  %v688_v20 = vmax.f32 %v686_v8, 0.0 }
 0x12e   :  { %v1141_v12 = vmax.f32 %v1140_v3, 0.0  ;;  %v1496_v28 = vpop.eup %1495  ;;  %v1258_v58 = vadd.f32 %v1257_v49, %v1241_v43  ;;  %v2265_v21 = vmax.f32 %v687_v51, %v693_v54  ;;  %v1276_v50 = vstv %s1475_s18 }
 0x12f   :  { %v835_v40 = vsel %vm834_vm1, %v1494_v18, %v831_v17  ;;  %v986_v13 = vmul.f32 %v1496_v28, %v2240_v7  ;;  %v698_v24 = vsel %vm112_vm0, %v697_v4, %v693_v54  ;;  %vm992_vm2 = vweird.f32 %v1496_v28 }
 0x130   :  { %v837_v38 = vmul.f32 %v836_v35, %v835_v40  ;;  %v2259_v44 = vadd.f32 1e-05, %v1141_v12  ;;  %v2262_v9 = vmul.f32 0.03125, %v1258_v58  ;;  %699 = vrot.lane.b32.xlu0 %v698_v24, %s1570_s26  ;;  %v2276_v33 = vmax.f32 %v688_v20, %v694_v39  ;;  %vm993_vm4 = vmor %vm991_vm3, %vm992_vm2 }
 0x131   :  { %v987_v10 = vmul.f32 %v1496_v28, %v986_v13  ;;  %v995_v41 = vstv %s2256_s17 }
 0x132   :  { %1497 = vrsqrt.f32 %v2259_v44  ;;  %s1477_s19 = spop %1476  ;;  %v839_v18 = vmul.f32 %v837_v38, %v2196_v46  ;;  %v848_v61 = vmul.f32 %v837_v38, %v1954_v59  ;;  %v849_v15 = vmul.f32 %v837_v38, %v1961_v56 }
 0x133   :  { %v1294_v37 = vstv %s1477_s19  ;;  %v988_v62 = vmul.f32 0.5, %v987_v10  ;;  %v1298_v26 = vmul.f32 %v2262_v9, %v2262_v9  ;;  %v842_v46 = vmul.f32 %v837_v38, %v1932_v23 }
 0x134   :  { %v1295_v19 = vadd.f32 %v1294_v37, %v1276_v50  ;;  %v841_v30 = vsub.f32 %v840_v53, %v839_v18  ;;  %v843_v27 = vmul.f32 %v837_v38, %v1937_v31  ;;  %v999_v38 = vstv %s2272_s20 }
 0x135   :  { %v989_v34 = vsub.f32 1.5, %v988_v62  ;;  %vm1150_vm6 = vweird.f32 %v2259_v44  ;;  %v1154_v50 = vstv %s2282_s21 }
 0x136   :  { %v1297_v32 = vmul.f32 0.03125, %v1295_v19  ;;  %v850_v2 = vadd.f32 %v848_v61, %v841_v30  ;;  %v851_v59 = vadd.f32 %v849_v15, %v841_v30  ;;  %v844_v29 = vadd.f32 %v842_v46, %v841_v30 }
 0x137   :  { %v845_v56 = vadd.f32 %v843_v27, %v841_v30  ;;  %v990_v35 = vmul.f32 %v1496_v28, %v989_v34 }
 0x138   :  { %v1498_v16 = vpop.eup %1497  ;;  %v1299_v3 = vsub.f32 %v1297_v32, %v1298_v26  ;;  %v852_v39 = vmax.f32 %v850_v2, 0.0  ;;  %v853_v17 = vmax.f32 %v851_v59, 0.0  ;;  %v846_v31 = vmax.f32 %v844_v29, 0.0 }
 0x139   :  { %v1145_v23 = vmul.f32 %v1498_v16, %v2259_v44  ;;  %v847_v54 = vmax.f32 %v845_v56, 0.0  ;;  %v994_v8 = vsel %vm993_vm4, %v1496_v28, %v990_v35  ;;  %vm1151_vm5 = vweird.f32 %v1498_v16 }
 0x13a   :  { %v1300_v51 = vmax.f32 %v1299_v3, 0.0  ;;  %v856_v7 = vrot.slane %v853_v17, 7  ;;  %v996_v12 = vmul.f32 %v995_v41, %v994_v8  ;;  %v2286_v49 = vmax.f32 %v846_v31, %v852_v39  ;;  %vm1152_vm7 = vmor %vm1150_vm6, %vm1151_vm5  ;;  %v2387_v3 = vld [vmem:[#allocation12_spill] sm:$0xff] }
 0x13b   :  { %v1146_v43 = vmul.f32 %v1498_v16, %v1145_v23  ;;  %v2288_v4 = vmax.f32 %v847_v54, %v853_v17  ;;  %v1158_v32 = vstv %s2294_s22  ;;  %v2388_v17 = vld [vmem:[#allocation13_spill] sm:$0xff] }
 0x13c   :  { %v1302_v40 = vadd.f32 1e-05, %v1300_v51  ;;  %v857_v58 = vsel %vm112_vm0, %v856_v7, %v852_v39  ;;  %v998_v53 = vmul.f32 %v996_v12, %v2216_v57  ;;  %v1007_v28 = vmul.f32 %v996_v12, %v1993_v60 }
 0x13d   :  { %v1147_v13 = vmul.f32 0.5, %v1146_v43  ;;  %858 = vrot.lane.b32.xlu1 %v857_v58, %s1570_s26  ;;  %v1008_v10 = vmul.f32 %v996_v12, %v1995_v14  ;;  %v1001_v18 = vmul.f32 %v996_v12, %v2009_v25  ;;  %v1002_v37 = vmul.f32 %v996_v12, %v2016_v52 }
 0x13e   :  { %1499 = vrsqrt.f32 %v1302_v40  ;;  %v1000_v20 = vsub.f32 %v999_v38, %v998_v53  ;;  %vm1309_vm9 = vweird.f32 %v1302_v40 }
 0x13f   :  { %v1148_v24 = vsub.f32 1.5, %v1147_v13 }
 0x140   :  { %v1009_v57 = vadd.f32 %v1007_v28, %v1000_v20  ;;  %v1010_v62 = vadd.f32 %v1008_v10, %v1000_v20  ;;  %v1003_v19 = vadd.f32 %v1001_v18, %v1000_v20  ;;  %v1004_v30 = vadd.f32 %v1002_v37, %v1000_v20 }
 0x141   :  { %v1149_v61 = vmul.f32 %v1498_v16, %v1148_v24  ;;  %v1317_v18 = vstv %s1413_s24 }
 0x142   :  { %v1011_v60 = vmax.f32 %v1009_v57, 0.0  ;;  %v1012_v26 = vmax.f32 %v1010_v62, 0.0  ;;  %v1005_v46 = vmax.f32 %v1003_v19, 0.0  ;;  %v1006_v34 = vmax.f32 %v1004_v30, 0.0 }
 0x143   :  { %v1153_v15 = vsel %vm1152_vm7, %v1498_v16, %v1149_v61 }
 0x144   :  { %v1500_v27 = vpop.eup %1499  ;;  %v1155_v14 = vmul.f32 %v1154_v50, %v1153_v15  ;;  %v1015_v44 = vrot.slane %v1012_v26, 7  ;;  %v2305_v52 = vmax.f32 %v1005_v46, %v1011_v60  ;;  %v2308_v59 = vmax.f32 %v1006_v34, %v1012_v26 }
 0x145   :  { %v1304_v25 = vmul.f32 %v1500_v27, %v1302_v40  ;;  %vm1310_vm8 = vweird.f32 %v1500_v27 }
 0x146   :  { %v1157_v2 = vmul.f32 %v1155_v14, %v2242_v45  ;;  %v1016_v29 = vsel %vm112_vm0, %v1015_v44, %v1011_v60  ;;  %v1166_v56 = vmul.f32 %v1155_v14, %v2069_v42  ;;  %v1167_v35 = vmul.f32 %v1155_v14, %v2071_v22  ;;  %vm1311_vm10 = vmor %vm1309_vm9, %vm1310_vm8 }
 0x147   :  { %v1305_v41 = vmul.f32 %v1500_v27, %v1304_v25  ;;  %1017 = vrot.lane.b32.xlu2 %v1016_v29, %s1570_s26  ;;  %v1160_v39 = vmul.f32 %v1155_v14, %v2387_v3  ;;  %v1161_v23 = vmul.f32 %v1155_v14, %v2388_v17  ;;  %v1313_v22 = vstv %s2302_s23 }
 0x148   :  { %v1159_v16 = vsub.f32 %v1158_v32, %v1157_v2 }
 0x149   :  { %v1306_v31 = vmul.f32 0.5, %v1305_v41 }
 0x14a   :  { %v1168_v45 = vadd.f32 %v1166_v56, %v1159_v16  ;;  %v1169_v54 = vadd.f32 %v1167_v35, %v1159_v16  ;;  %v1162_v8 = vadd.f32 %v1160_v39, %v1159_v16  ;;  %v1163_v51 = vadd.f32 %v1161_v23, %v1159_v16 }
 0x14b   :  { %v1307_v7 = vsub.f32 1.5, %v1306_v31 }
 0x14c   :  { %v1170_v12 = vmax.f32 %v1168_v45, 0.0  ;;  %v1171_v42 = vmax.f32 %v1169_v54, 0.0  ;;  %v1164_v43 = vmax.f32 %v1162_v8, 0.0  ;;  %v1165_v58 = vmax.f32 %v1163_v51, 0.0 }
 0x14d   :  { %v1308_v38 = vmul.f32 %v1500_v27, %v1307_v7 }
 0x14e   :  { %v1174_v13 = vrot.slane %v1171_v42, 7  ;;  %v2317_v53 = vmax.f32 %v1164_v43, %v1170_v12  ;;  %v2319_v28 = vmax.f32 %v1165_v58, %v1171_v42 }
 0x14f   :  { %v1312_v24 = vsel %vm1311_vm10, %v1500_v27, %v1308_v38 }
 0x150   :  { %v1314_v20 = vmul.f32 %v1313_v22, %v1312_v24  ;;  %v1175_v10 = vsel %vm112_vm0, %v1174_v13, %v1170_v12 }
 0x151   :  { %1176 = vrot.lane.b32.xlu0 %v1175_v10, %s1570_s26 }
 0x152   :  { %v1316_v50 = vmul.f32 %v1314_v20, %v2262_v9  ;;  %v1325_v37 = vmul.f32 %v1314_v20, %v2110_v0  ;;  %v1326_v40 = vmul.f32 %v1314_v20, %v2112_v47  ;;  %v1319_v57 = vmul.f32 %v1314_v20, %v2097_v36 }
 0x153   :  { %v1320_v62 = vmul.f32 %v1314_v20, %v2099_v6 }
 0x154   :  { %v1318_v61 = vsub.f32 %v1317_v18, %v1316_v50 }
 0x156   :  { %v1327_v19 = vadd.f32 %v1325_v37, %v1318_v61  ;;  %v1328_v30 = vadd.f32 %v1326_v40, %v1318_v61  ;;  %v1321_v15 = vadd.f32 %v1319_v57, %v1318_v61  ;;  %v1322_v60 = vadd.f32 %v1320_v62, %v1318_v61 }
 0x158   :  { %v1329_v26 = vmax.f32 %v1327_v19, 0.0  ;;  %v1330_v46 = vmax.f32 %v1328_v30, 0.0  ;;  %v1323_v27 = vmax.f32 %v1321_v15, 0.0  ;;  %v1324_v14 = vmax.f32 %v1322_v60, 0.0 }
 0x15a   :  { %v1333_v34 = vrot.slane %v1330_v46, 7  ;;  %v2328_v25 = vmax.f32 %v1323_v27, %v1329_v26  ;;  %v2330_v9 = vmax.f32 %v1324_v14, %v1330_v46 }
 0x15c   :  { %v1334_v0 = vsel %vm112_vm0, %v1333_v34, %v1329_v26 }
 0x15d   :  { %1335 = vrot.lane.b32.xlu1 %v1334_v0, %s1570_s26  ;;  %s1353_s26 = sshll.u32 %s1571_s25, 4  ;;  %s1354_s26 = int_to_ptr.vmem [resolvable:$true] %s1353_s26 }
 0x161   :  { %v221_v36 = vpop.permute.xlu2 %220 }
 0x162   :  { %v224_v6 = vsel %vm223_vm11, 0.0, %v221_v36 }
 0x163   :  { %v228_v47 = vrot.slane %v224_v6, 1  ;;  %v231_v44 = vmax.f32 %v2170_v5, %v224_v6 }
 0x165   :  { %v232_v32 = vmax.f32 %v2172_v63, %v228_v47  ;;  %234 = vst.msk [vmem:[#allocation8] sm:$0x1] %vm233_vm12, %v231_v44 }
 0x167   :  { %235 = vst.msk [vmem:[#allocation8 + $0x8] sm:$0x1] %vm233_vm12, %v232_v32 }
 0x180   :  { %v541_v2 = vpop.permute.xlu2 %540 }
 0x181   :  { %v543_v41 = vsel %vm223_vm11, 0.0, %v541_v2 }
 0x182   :  { %v547_v29 = vrot.slane %v543_v41, 1  ;;  %v550_v56 = vmax.f32 %v2232_v48, %v543_v41 }
 0x184   :  { %v551_v16 = vmax.f32 %v2234_v1, %v547_v29  ;;  %552 = vst.msk [vmem:[#allocation8 + $0x2] sm:$0x1] %vm233_vm12, %v550_v56 }
 0x186   :  { %553 = vst.msk [vmem:[#allocation8 + $0xa] sm:$0x1] %vm233_vm12, %v551_v16 }
 0x187   :  { %v382_v35 = vpop.permute.xlu1 %381 }
 0x188   :  { %v384_v5 = vsel %vm223_vm11, 0.0, %v382_v35 }
 0x189   :  { %v388_v63 = vrot.slane %v384_v5, 1  ;;  %v391_v3 = vmax.f32 %v2198_v11, %v384_v5 }
 0x18b   :  { %v392_v39 = vmax.f32 %v2201_v55, %v388_v63  ;;  %393 = vst.msk [vmem:[#allocation8 + $0x1] sm:$0x1] %vm233_vm12, %v391_v3 }
 0x18d   :  { %394 = vst.msk [vmem:[#allocation8 + $0x9] sm:$0x1] %vm233_vm12, %v392_v39 }
 0x1a1   :  { %v1018_v17 = vpop.permute.xlu2 %1017 }
 0x1a2   :  { %v1020_v48 = vsel %vm223_vm11, 0.0, %v1018_v17  ;;  %v700_v31 = vpop.permute.xlu0 %699 }
 0x1a3   :  { %v1024_v1 = vrot.slane %v1020_v48, 1  ;;  %v1027_v23 = vmax.f32 %v2305_v52, %v1020_v48  ;;  %v702_v45 = vsel %vm223_vm11, 0.0, %v700_v31 }
 0x1a4   :  { %v706_v11 = vrot.slane %v702_v45, 1  ;;  %v709_v55 = vmax.f32 %v2265_v21, %v702_v45 }
 0x1a5   :  { %v1028_v54 = vmax.f32 %v2308_v59, %v1024_v1  ;;  %1029 = vst.msk [vmem:[#allocation8 + $0x5] sm:$0x1] %vm233_vm12, %v1027_v23 }
 0x1a6   :  { %v710_v8 = vmax.f32 %v2276_v33, %v706_v11  ;;  %711 = vst.msk [vmem:[#allocation8 + $0x3] sm:$0x1] %vm233_vm12, %v709_v55 }
 0x1a7   :  { %1030 = vst.msk [vmem:[#allocation8 + $0xd] sm:$0x1] %vm233_vm12, %v1028_v54 }
 0x1a8   :  { %712 = vst.msk [vmem:[#allocation8 + $0xb] sm:$0x1] %vm233_vm12, %v710_v8 }
 0x1af   :  { %v859_v51 = vpop.permute.xlu1 %858 }
 0x1b0   :  { %v861_v52 = vsel %vm223_vm11, 0.0, %v859_v51 }
 0x1b1   :  { %v865_v7 = vrot.slane %v861_v52, 1  ;;  %v868_v12 = vmax.f32 %v2286_v49, %v861_v52 }
 0x1b3   :  { %v869_v59 = vmax.f32 %v2288_v4, %v865_v7  ;;  %870 = vst.msk [vmem:[#allocation8 + $0x4] sm:$0x1] %vm233_vm12, %v868_v12 }
 0x1b5   :  { %871 = vst.msk [vmem:[#allocation8 + $0xc] sm:$0x1] %vm233_vm12, %v869_v59 }
 0x1c3   :  { %v1177_v21 = vpop.permute.xlu0 %1176 }
 0x1c4   :  { %v1179_v42 = vsel %vm223_vm11, 0.0, %v1177_v21 }
 0x1c5   :  { %v1183_v33 = vrot.slane %v1179_v42, 1  ;;  %v1186_v43 = vmax.f32 %v2317_v53, %v1179_v42 }
 0x1c7   :  { %v1187_v58 = vmax.f32 %v2319_v28, %v1183_v33  ;;  %1188 = vst.msk [vmem:[#allocation8 + $0x6] sm:$0x1] %vm233_vm12, %v1186_v43 }
 0x1c9   :  { %1189 = vst.msk [vmem:[#allocation8 + $0xe] sm:$0x1] %vm233_vm12, %v1187_v58 }
 0x1cf   :  { %v1336_v38 = vpop.permute.xlu1 %1335 }
 0x1d0   :  { %v1338_v49 = vsel %vm223_vm11, 0.0, %v1336_v38 }
 0x1d1   :  { %v1342_v4 = vrot.slane %v1338_v49, 1  ;;  %v1345_v22 = vmax.f32 %v2328_v25, %v1338_v49 }
 0x1d3   :  { %v1346_v13 = vmax.f32 %v2330_v9, %v1342_v4  ;;  %1347 = vst.msk [vmem:[#allocation8 + $0x7] sm:$0x1] %vm233_vm12, %v1345_v22 }
 0x1d5   :  { %1348 = vst.msk [vmem:[#allocation8 + $0xf] sm:$0x1] %vm233_vm12, %v1346_v13 }
 0x1d6   :  { %1361 = dma.vmem_to_hbm [thread:$0]  %s1354_s26, 256, %s1356_s29, [#allocation3], %s1572_s1, %s1572_s1, %s1573_s6  }
 0x1d7   :  { %1565 = dma.done.wait [#allocation3], 256  }
 0x1d8   :  { %1566 = vsyncadd [#allocation3], 4294967040 }
 0x1d9   :  { %1366 = vsyncpa [#allocation3], 1 }
 0x1da   :  { %1367 = vsyncpa [#allocation4], 1 }
 0x1db   :  { %1368 = vsyncpa [#allocation6], 1 }

</bundles_post_ra>
